<compile_context>
chip_gen: v7x
topology: tpu7x:2x2x1
jax: 0.10.0
libtpu: 0.0.40
codegen_flags: <defaults>
</compile_context>

<pallas_src>
import functools

import jax
import jax.numpy as jnp
from jax import lax
from jax.experimental import pallas as pl
from jax.experimental.pallas import tpu as pltpu


# ----------------------------------------------------------------------------
# Pallas kernel
# ----------------------------------------------------------------------------
def _make_kernel(T, B, D, H, LA):
    """Builds the fused GRU + attention + FC kernel (all constants baked in)."""
    TB = T * B

    def kernel(x_ref,          # (T*B, D)   time-major flattened input
               w_ih_ref,       # (3, D, H)  per-gate input weights [r, z, n]
               wh_ref,         # (5, H, H)  [W_hh_r, W_hh_z, W_hh_n, attn_w1, attn_w2]
               bias_ref,       # (8, H)     rows: [b_r, b_z, b_in, b_hn, attn_b, v, 0, 0]
               fc_ref,         # (H+1, 3*LA) rows 0..H-1 = fc_w_T, row H = fc_b
               out_ref,        # (B, 3*LA)
               rnn_scratch):   # VMEM (T*B, H) -- all GRU hidden states, flat
        x_flat = x_ref[...]                                            # (TB, D)

        b_r    = bias_ref[0:1, :]      # combined r bias (b_ih_r + b_hh_r)
        b_z    = bias_ref[1:2, :]      # combined z bias
        b_in   = bias_ref[2:3, :]      # input-side n bias (folded into gx_n)
        b_hn   = bias_ref[3:4, :]      # hidden-side n bias (added per step)
        attn_b = bias_ref[4:5, :]
        v_row  = bias_ref[5:6, :]

        # -------- input-side gate projections hoisted out of the loop --------
        gx_r = jnp.dot(x_flat, w_ih_ref[0], preferred_element_type=jnp.float32) + b_r
        gx_z = jnp.dot(x_flat, w_ih_ref[1], preferred_element_type=jnp.float32) + b_z
        gx_n = jnp.dot(x_flat, w_ih_ref[2], preferred_element_type=jnp.float32) + b_in

        w_hr = wh_ref[0]
        w_hz = wh_ref[1]
        w_hn = wh_ref[2]

        # -------- fully unrolled recurrence (T is a compile-time constant) ---
        # Only the loop-carried h @ W_hh matmuls stay on the critical path.
        # TODO(synk): could pin W_hh in MXU weight regs via pltpu.matmul_push_rhs
        # across the unrolled steps; left to the compiler at these tiny shapes.
        h = jnp.zeros((B, H), jnp.float32)
        for t in range(T):
            lo, hi = t * B, (t + 1) * B
            gh_r = jnp.dot(h, w_hr, preferred_element_type=jnp.float32)
            gh_z = jnp.dot(h, w_hz, preferred_element_type=jnp.float32)
            gh_n = jnp.dot(h, w_hn, preferred_element_type=jnp.float32) + b_hn
            r = jax.nn.sigmoid(gx_r[lo:hi, :] + gh_r)
            z = jax.nn.sigmoid(gx_z[lo:hi, :] + gh_z)
            n = jnp.tanh(gx_n[lo:hi, :] + r * gh_n)
            h = (1.0 - z) * n + z * h
            rnn_scratch[lo:hi, :] = h                                  # static rows
        hn = h                                                         # (B, H)

        rnn_all = rnn_scratch[...]                                     # (TB, H)

        # ---------------- Attention (flat, reshape-free) ---------------------
        hn_part  = jnp.dot(hn, wh_ref[3],
                           preferred_element_type=jnp.float32) + attn_b   # (B, H)
        enc_part = jnp.dot(rnn_all, wh_ref[4],
                           preferred_element_type=jnp.float32)            # (TB, H)

        # Broadcast hn_part over time with a selection-matrix matmul:
        # gmat[j, b] = 1 iff (j % B) == b   ->   hn_bcast[j] = hn_part[j % B]
        jrow = lax.broadcasted_iota(jnp.int32, (TB, B), 0)
        jcol = lax.broadcasted_iota(jnp.int32, (TB, B), 1)
        gmat = (jrow % B == jcol).astype(jnp.float32)                     # (TB, B)
        hn_bcast = jnp.dot(gmat, hn_part, preferred_element_type=jnp.float32)

        energy = jnp.tanh(hn_bcast + enc_part)                            # (TB, H)
        scores = jnp.sum(energy * v_row, axis=-1, keepdims=True)          # (TB, 1)

        # Softmax over time per batch element (global max is a valid stabilizer).
        m = jnp.max(scores)
        e = jnp.exp(scores - m)                                           # (TB, 1)

        # Grouped (per-b) sums over time via a selection matrix:
        # smat[b, j] = 1 iff (j % B) == b
        srow = lax.broadcasted_iota(jnp.int32, (B, TB), 0)
        scol = lax.broadcasted_iota(jnp.int32, (B, TB), 1)
        smat = (scol % B == srow).astype(jnp.float32)                     # (B, TB)
        numer = jnp.dot(smat, e * rnn_all,
                        preferred_element_type=jnp.float32)               # (B, H)
        denom = jnp.dot(smat, e, preferred_element_type=jnp.float32)      # (B, 1)
        context = numer / denom                                           # (B, H)

        # ---------------- FC head + per-block output squashing ---------------
        fc_w = fc_ref[0:H, :]                                             # (H, 3*LA)
        fc_b = fc_ref[H:H + 1, :]                                         # (1, 3*LA)
        fc_out = jnp.dot(context, fc_w,
                         preferred_element_type=jnp.float32) + fc_b
        sig = jax.nn.sigmoid(fc_out)                                      # (B, 3*LA)
        col = lax.broadcasted_iota(jnp.int32, fc_out.shape, 1)
        out_ref[...] = jnp.where(col < LA, 2.0 * sig - 1.0,
                                 jnp.where(col < 2 * LA,
                                           10.0 * (2.0 * sig - 1.0),
                                           10.0 * sig))

    return kernel


# ----------------------------------------------------------------------------
# Wrapper (packs params, calls the kernel)
# ----------------------------------------------------------------------------
@functools.partial(jax.jit, static_argnames=("hidden", "look_ahead"))
def gru_model_s_month_forward(x_btd, params, *, hidden, look_ahead):
    """x_btd: (B, T, D) float32, batch-first like the PyTorch module."""
    B, T, D = x_btd.shape
    H = hidden
    LA = look_ahead
    O = 3 * LA

    # Time-major, flattened: row j <-> (t = j // B, b = j % B).
    x_flat = jnp.transpose(x_btd, (1, 0, 2)).reshape(T * B, D).astype(jnp.float32)

    w_ih_T = params["w_ih_T"].astype(jnp.float32)        # (D, 3H)
    w_hh_T = params["w_hh_T"].astype(jnp.float32)        # (H, 3H)
    aw = params["attn_w_T"].astype(jnp.float32)          # (2H, H)

    # Per-gate weight stacks (avoid in-kernel 32-lane-offset slicing).
    w_ih_g = jnp.stack([w_ih_T[:, 0:H], w_ih_T[:, H:2 * H], w_ih_T[:, 2 * H:3 * H]],
                       axis=0)                           # (3, D, H)
    wmat_h = jnp.stack([w_hh_T[:, 0:H], w_hh_T[:, H:2 * H], w_hh_T[:, 2 * H:3 * H],
                        aw[:H, :], aw[H:, :]], axis=0)   # (5, H, H)

    b_ih = params["b_ih"][0].astype(jnp.float32)
    b_hh = params["b_hh"][0].astype(jnp.float32)
    zeros_h = jnp.zeros((H,), jnp.float32)
    bias_rows = jnp.stack([
        b_ih[0:H] + b_hh[0:H],            # combined r bias
        b_ih[H:2 * H] + b_hh[H:2 * H],    # combined z bias
        b_ih[2 * H:3 * H],                # input-side n bias
        b_hh[2 * H:3 * H],                # hidden-side n bias
        params["attn_b"][0].astype(jnp.float32),
        params["v"][0].astype(jnp.float32),
        zeros_h, zeros_h,
    ], axis=0)                            # (8, H)

    fc_pack = jnp.concatenate(
        [params["fc_w_T"].astype(jnp.float32),
         params["fc_b"].astype(jnp.float32)], axis=0)    # (H+1, O)

    kernel = _make_kernel(T, B, D, H, LA)
    vmem = pl.BlockSpec(memory_space=pltpu.MemorySpace.VMEM)

    out = pl.pallas_call(
        kernel,
        out_shape=jax.ShapeDtypeStruct((B, O), jnp.float32),
        in_specs=[vmem] * 5,
        out_specs=vmem,
        scratch_shapes=[pltpu.VMEM((T * B, H), jnp.float32)],
    )(x_flat, w_ih_g, wmat_h, bias_rows, fc_pack)
    return out


# ----------------------------------------------------------------------------
# Pure-JAX reference (mirrors the PyTorch forward) for a sanity check
# ----------------------------------------------------------------------------
def reference_forward(x_btd, params, H, LA):
    B, T, D = x_btd.shape
    w_ih, w_hh = params["w_ih_T"], params["w_hh_T"]
    b_ih, b_hh = params["b_ih"], params["b_hh"]

    def step(h, x_t):
        gx = x_t @ w_ih + b_ih
        gh = h @ w_hh + b_hh
        r = jax.nn.sigmoid(gx[:, :H] + gh[:, :H])
        z = jax.nn.sigmoid(gx[:, H:2 * H] + gh[:, H:2 * H])
        n = jnp.tanh(gx[:, 2 * H:] + r * gh[:, 2 * H:])
        h_new = (1.0 - z) * n + z * h
        return h_new, h_new

    hn, rnn = lax.scan(step, jnp.zeros((B, H), jnp.float32),
                       jnp.transpose(x_btd, (1, 0, 2)))
    rnn = jnp.transpose(rnn, (1, 0, 2))                        # (B, T, H)

    aw = params["attn_w_T"]
    hn_part = hn @ aw[:H] + params["attn_b"]                   # (B, H)
    enc_part = jnp.einsum("bth,hk->btk", rnn, aw[H:])
    energy = jnp.tanh(hn_part[:, None, :] + enc_part)          # (B, T, H)
    scores = jnp.sum(energy * params["v"][0][None, None, :], axis=-1)  # (B, T)
    alpha = jax.nn.softmax(scores, axis=-1)
    context = jnp.einsum("bt,bth->bh", alpha, rnn)

    fc_out = context @ params["fc_w_T"] + params["fc_b"]
    sig = jax.nn.sigmoid(fc_out)
    out = jnp.concatenate([2 * sig[:, :LA] - 1,
                           10 * (2 * sig[:, LA:2 * LA] - 1),
                           10 * sig[:, 2 * LA:]], axis=1)
    return out


# ----------------------------------------------------------------------------
if __name__ == "__main__":
    # Shapes consistent with the module: GRU(inputDim -> hiddenNum),
    # layerNum = 1 (hn.view requires it), outputDim = 3, lookAhead = 1.
    B, T, D, H = 2, 8, 4, 32
    LA, OUT_DIM = 1, 3
    O = OUT_DIM * LA

    key = jax.random.PRNGKey(0)
    ks = jax.random.split(key, 12)

    scale = 0.1
    params = {
        "w_ih_T":   scale * jax.random.normal(ks[0], (D, 3 * H), jnp.float32),
        "w_hh_T":   scale * jax.random.normal(ks[1], (H, 3 * H), jnp.float32),
        "b_ih":     scale * jax.random.normal(ks[2], (1, 3 * H), jnp.float32),
        "b_hh":     scale * jax.random.normal(ks[3], (1, 3 * H), jnp.float32),
        "attn_w_T": scale * jax.random.normal(ks[4], (2 * H, H), jnp.float32),
        "attn_b":   scale * jax.random.normal(ks[5], (1, H), jnp.float32),
        "v":        scale * jax.random.normal(ks[6], (1, H), jnp.float32),
        "fc_w_T":   scale * jax.random.normal(ks[7], (H, O), jnp.float32),
        "fc_b":     scale * jax.random.normal(ks[8], (1, O), jnp.float32),
    }

    x = jax.random.normal(ks[9], (B, T, D), jnp.float32)

    out = gru_model_s_month_forward(x, params, hidden=H, look_ahead=LA)
    out = jax.block_until_ready(out)

    ref = reference_forward(x, params, H, LA)
    assert out.shape == (B, O)
    assert jnp.all(jnp.isfinite(out))
    assert jnp.allclose(out, ref, rtol=1e-4, atol=1e-4), (out, ref)

    print("KERNEL_OK")
</pallas_src>

<mosaic_0001>
module attributes {stable_mosaic.version = 11 : i64} {
  func.func @kernel(%arg0: memref<16x4xf32, #tpu.memory_space<vmem>>, %arg1: memref<3x4x32xf32, #tpu.memory_space<vmem>>, %arg2: memref<5x32x32xf32, #tpu.memory_space<vmem>>, %arg3: memref<8x32xf32, #tpu.memory_space<vmem>>, %arg4: memref<33x3xf32, #tpu.memory_space<vmem>>, %arg5: memref<2x3xf32, #tpu.memory_space<vmem>>, %arg6: memref<16x32xf32, #tpu.memory_space<vmem>>) attributes {dimension_semantics = [], scalar_prefetch = 0 : i64, scratch_operands = 1 : i64, tpu.core_type = #tpu.core_type<tc>} {
    %c0 = arith.constant 0 : index
    %c0_0 = arith.constant 0 : index
    %0 = vector.load %arg0[%c0, %c0_0] : memref<16x4xf32, #tpu.memory_space<vmem>>, vector<16x4xf32>
    %c0_1 = arith.constant 0 : index
    %c0_2 = arith.constant 0 : index
    %1 = vector.load %arg3[%c0_1, %c0_2] : memref<8x32xf32, #tpu.memory_space<vmem>>, vector<1x32xf32>
    %c1 = arith.constant 1 : index
    %c0_3 = arith.constant 0 : index
    %2 = vector.load %arg3[%c1, %c0_3] : memref<8x32xf32, #tpu.memory_space<vmem>>, vector<1x32xf32>
    %c2 = arith.constant 2 : index
    %c0_4 = arith.constant 0 : index
    %3 = vector.load %arg3[%c2, %c0_4] : memref<8x32xf32, #tpu.memory_space<vmem>>, vector<1x32xf32>
    %c3 = arith.constant 3 : index
    %c0_5 = arith.constant 0 : index
    %4 = vector.load %arg3[%c3, %c0_5] : memref<8x32xf32, #tpu.memory_space<vmem>>, vector<1x32xf32>
    %c4 = arith.constant 4 : index
    %c0_6 = arith.constant 0 : index
    %5 = vector.load %arg3[%c4, %c0_6] : memref<8x32xf32, #tpu.memory_space<vmem>>, vector<1x32xf32>
    %c5 = arith.constant 5 : index
    %c0_7 = arith.constant 0 : index
    %6 = vector.load %arg3[%c5, %c0_7] : memref<8x32xf32, #tpu.memory_space<vmem>>, vector<1x32xf32>
    %c0_8 = arith.constant 0 : index
    %c0_9 = arith.constant 0 : index
    %c0_10 = arith.constant 0 : index
    %7 = vector.load %arg1[%c0_8, %c0_9, %c0_10] : memref<3x4x32xf32, #tpu.memory_space<vmem>>, vector<1x4x32xf32>
    %8 = vector.shape_cast %7 : vector<1x4x32xf32> to vector<4x32xf32>
    %cst = arith.constant dense<0.000000e+00> : vector<16x32xf32>
    %9 = tpu.matmul %0, %8, %cst {dimension_numbers = #tpu.dot_dimension_numbers<[1], [0], [0], [1], [0, 0, 1, 1], [], []>} : vector<16x4xf32>, vector<4x32xf32>, vector<16x32xf32> -> vector<16x32xf32>
    %10 = vector.broadcast %1 : vector<1x32xf32> to vector<16x32xf32>
    %11 = arith.addf %9, %10 : vector<16x32xf32>
    %c1_11 = arith.constant 1 : index
    %c0_12 = arith.constant 0 : index
    %c0_13 = arith.constant 0 : index
    %12 = vector.load %arg1[%c1_11, %c0_12, %c0_13] : memref<3x4x32xf32, #tpu.memory_space<vmem>>, vector<1x4x32xf32>
    %13 = vector.shape_cast %12 : vector<1x4x32xf32> to vector<4x32xf32>
    %cst_14 = arith.constant dense<0.000000e+00> : vector<16x32xf32>
    %14 = tpu.matmul %0, %13, %cst_14 {dimension_numbers = #tpu.dot_dimension_numbers<[1], [0], [0], [1], [0, 0, 1, 1], [], []>} : vector<16x4xf32>, vector<4x32xf32>, vector<16x32xf32> -> vector<16x32xf32>
    %15 = vector.broadcast %2 : vector<1x32xf32> to vector<16x32xf32>
    %16 = arith.addf %14, %15 : vector<16x32xf32>
    %c2_15 = arith.constant 2 : index
    %c0_16 = arith.constant 0 : index
    %c0_17 = arith.constant 0 : index
    %17 = vector.load %arg1[%c2_15, %c0_16, %c0_17] : memref<3x4x32xf32, #tpu.memory_space<vmem>>, vector<1x4x32xf32>
    %18 = vector.shape_cast %17 : vector<1x4x32xf32> to vector<4x32xf32>
    %cst_18 = arith.constant dense<0.000000e+00> : vector<16x32xf32>
    %19 = tpu.matmul %0, %18, %cst_18 {dimension_numbers = #tpu.dot_dimension_numbers<[1], [0], [0], [1], [0, 0, 1, 1], [], []>} : vector<16x4xf32>, vector<4x32xf32>, vector<16x32xf32> -> vector<16x32xf32>
    %20 = vector.broadcast %3 : vector<1x32xf32> to vector<16x32xf32>
    %21 = arith.addf %19, %20 : vector<16x32xf32>
    %c0_19 = arith.constant 0 : index
    %c0_20 = arith.constant 0 : index
    %c0_21 = arith.constant 0 : index
    %22 = vector.load %arg2[%c0_19, %c0_20, %c0_21] : memref<5x32x32xf32, #tpu.memory_space<vmem>>, vector<1x32x32xf32>
    %23 = vector.shape_cast %22 : vector<1x32x32xf32> to vector<32x32xf32>
    %c1_22 = arith.constant 1 : index
    %c0_23 = arith.constant 0 : index
    %c0_24 = arith.constant 0 : index
    %24 = vector.load %arg2[%c1_22, %c0_23, %c0_24] : memref<5x32x32xf32, #tpu.memory_space<vmem>>, vector<1x32x32xf32>
    %25 = vector.shape_cast %24 : vector<1x32x32xf32> to vector<32x32xf32>
    %c2_25 = arith.constant 2 : index
    %c0_26 = arith.constant 0 : index
    %c0_27 = arith.constant 0 : index
    %26 = vector.load %arg2[%c2_25, %c0_26, %c0_27] : memref<5x32x32xf32, #tpu.memory_space<vmem>>, vector<1x32x32xf32>
    %27 = vector.shape_cast %26 : vector<1x32x32xf32> to vector<32x32xf32>
    %cst_28 = arith.constant 0.000000e+00 : f32
    %28 = vector.broadcast %cst_28 : f32 to vector<2x32xf32>
    %cst_29 = arith.constant dense<0.000000e+00> : vector<2x32xf32>
    %29 = tpu.matmul %28, %23, %cst_29 {dimension_numbers = #tpu.dot_dimension_numbers<[1], [0], [0], [1], [0, 0, 1, 1], [], []>} : vector<2x32xf32>, vector<32x32xf32>, vector<2x32xf32> -> vector<2x32xf32>
    %cst_30 = arith.constant dense<0.000000e+00> : vector<2x32xf32>
    %30 = tpu.matmul %28, %25, %cst_30 {dimension_numbers = #tpu.dot_dimension_numbers<[1], [0], [0], [1], [0, 0, 1, 1], [], []>} : vector<2x32xf32>, vector<32x32xf32>, vector<2x32xf32> -> vector<2x32xf32>
    %cst_31 = arith.constant dense<0.000000e+00> : vector<2x32xf32>
    %31 = tpu.matmul %28, %27, %cst_31 {dimension_numbers = #tpu.dot_dimension_numbers<[1], [0], [0], [1], [0, 0, 1, 1], [], []>} : vector<2x32xf32>, vector<32x32xf32>, vector<2x32xf32> -> vector<2x32xf32>
    %32 = vector.broadcast %4 : vector<1x32xf32> to vector<2x32xf32>
    %33 = arith.addf %31, %32 : vector<2x32xf32>
    %34 = vector.extract_strided_slice %11 {offsets = [0, 0], sizes = [2, 32], strides = [1, 1]} : vector<16x32xf32> to vector<2x32xf32>
    %35 = arith.addf %34, %29 : vector<2x32xf32>
    %36 = arith.negf %35 : vector<2x32xf32>
    %37 = math.exp %36 : vector<2x32xf32>
    %cst_32 = arith.constant 1.000000e+00 : f32
    %38 = vector.broadcast %cst_32 : f32 to vector<2x32xf32>
    %39 = arith.addf %38, %37 : vector<2x32xf32>
    %40 = arith.divf %38, %39 : vector<2x32xf32>
    %41 = vector.extract_strided_slice %16 {offsets = [0, 0], sizes = [2, 32], strides = [1, 1]} : vector<16x32xf32> to vector<2x32xf32>
    %42 = arith.addf %41, %30 : vector<2x32xf32>
    %43 = arith.negf %42 : vector<2x32xf32>
    %44 = math.exp %43 : vector<2x32xf32>
    %cst_33 = arith.constant 1.000000e+00 : f32
    %45 = vector.broadcast %cst_33 : f32 to vector<2x32xf32>
    %46 = arith.addf %45, %44 : vector<2x32xf32>
    %47 = arith.divf %45, %46 : vector<2x32xf32>
    %48 = vector.extract_strided_slice %21 {offsets = [0, 0], sizes = [2, 32], strides = [1, 1]} : vector<16x32xf32> to vector<2x32xf32>
    %49 = arith.mulf %40, %33 : vector<2x32xf32>
    %50 = arith.addf %48, %49 : vector<2x32xf32>
    %51 = math.tanh %50 : vector<2x32xf32>
    %cst_34 = arith.constant 1.000000e+00 : f32
    %52 = vector.broadcast %cst_34 : f32 to vector<2x32xf32>
    %53 = arith.subf %52, %47 : vector<2x32xf32>
    %54 = arith.mulf %53, %51 : vector<2x32xf32>
    %55 = arith.mulf %47, %28 : vector<2x32xf32>
    %56 = arith.addf %54, %55 : vector<2x32xf32>
    %c0_35 = arith.constant 0 : index
    %c0_36 = arith.constant 0 : index
    %57 = vector.load %arg6[%c0_35, %c0_36] : memref<16x32xf32, #tpu.memory_space<vmem>>, vector<2x32xf32>
    tpu.vector_store %arg6[%c0_35, %c0_36], %56 {strides = array<i32>} : memref<16x32xf32, #tpu.memory_space<vmem>>, vector<2x32xf32>,
    %cst_37 = arith.constant dense<0.000000e+00> : vector<2x32xf32>
    %58 = tpu.matmul %56, %23, %cst_37 {dimension_numbers = #tpu.dot_dimension_numbers<[1], [0], [0], [1], [0, 0, 1, 1], [], []>} : vector<2x32xf32>, vector<32x32xf32>, vector<2x32xf32> -> vector<2x32xf32>
    %cst_38 = arith.constant dense<0.000000e+00> : vector<2x32xf32>
    %59 = tpu.matmul %56, %25, %cst_38 {dimension_numbers = #tpu.dot_dimension_numbers<[1], [0], [0], [1], [0, 0, 1, 1], [], []>} : vector<2x32xf32>, vector<32x32xf32>, vector<2x32xf32> -> vector<2x32xf32>
    %cst_39 = arith.constant dense<0.000000e+00> : vector<2x32xf32>
    %60 = tpu.matmul %56, %27, %cst_39 {dimension_numbers = #tpu.dot_dimension_numbers<[1], [0], [0], [1], [0, 0, 1, 1], [], []>} : vector<2x32xf32>, vector<32x32xf32>, vector<2x32xf32> -> vector<2x32xf32>
    %61 = vector.broadcast %4 : vector<1x32xf32> to vector<2x32xf32>
    %62 = arith.addf %60, %61 : vector<2x32xf32>
    %63 = vector.extract_strided_slice %11 {offsets = [2, 0], sizes = [2, 32], strides = [1, 1]} : vector<16x32xf32> to vector<2x32xf32>
    %64 = arith.addf %63, %58 : vector<2x32xf32>
    %65 = arith.negf %64 : vector<2x32xf32>
    %66 = math.exp %65 : vector<2x32xf32>
    %cst_40 = arith.constant 1.000000e+00 : f32
    %67 = vector.broadcast %cst_40 : f32 to vector<2x32xf32>
    %68 = arith.addf %67, %66 : vector<2x32xf32>
    %69 = arith.divf %67, %68 : vector<2x32xf32>
    %70 = vector.extract_strided_slice %16 {offsets = [2, 0], sizes = [2, 32], strides = [1, 1]} : vector<16x32xf32> to vector<2x32xf32>
    %71 = arith.addf %70, %59 : vector<2x32xf32>
    %72 = arith.negf %71 : vector<2x32xf32>
    %73 = math.exp %72 : vector<2x32xf32>
    %cst_41 = arith.constant 1.000000e+00 : f32
    %74 = vector.broadcast %cst_41 : f32 to vector<2x32xf32>
    %75 = arith.addf %74, %73 : vector<2x32xf32>
    %76 = arith.divf %74, %75 : vector<2x32xf32>
    %77 = vector.extract_strided_slice %21 {offsets = [2, 0], sizes = [2, 32], strides = [1, 1]} : vector<16x32xf32> to vector<2x32xf32>
    %78 = arith.mulf %69, %62 : vector<2x32xf32>
    %79 = arith.addf %77, %78 : vector<2x32xf32>
    %80 = math.tanh %79 : vector<2x32xf32>
    %cst_42 = arith.constant 1.000000e+00 : f32
    %81 = vector.broadcast %cst_42 : f32 to vector<2x32xf32>
    %82 = arith.subf %81, %76 : vector<2x32xf32>
    %83 = arith.mulf %82, %80 : vector<2x32xf32>
    %84 = arith.mulf %76, %56 : vector<2x32xf32>
    %85 = arith.addf %83, %84 : vector<2x32xf32>
    %c2_43 = arith.constant 2 : index
    %c0_44 = arith.constant 0 : index
    %86 = vector.load %arg6[%c2_43, %c0_44] : memref<16x32xf32, #tpu.memory_space<vmem>>, vector<2x32xf32>
    tpu.vector_store %arg6[%c2_43, %c0_44], %85 {strides = array<i32>} : memref<16x32xf32, #tpu.memory_space<vmem>>, vector<2x32xf32>,
    %cst_45 = arith.constant dense<0.000000e+00> : vector<2x32xf32>
    %87 = tpu.matmul %85, %23, %cst_45 {dimension_numbers = #tpu.dot_dimension_numbers<[1], [0], [0], [1], [0, 0, 1, 1], [], []>} : vector<2x32xf32>, vector<32x32xf32>, vector<2x32xf32> -> vector<2x32xf32>
    %cst_46 = arith.constant dense<0.000000e+00> : vector<2x32xf32>
    %88 = tpu.matmul %85, %25, %cst_46 {dimension_numbers = #tpu.dot_dimension_numbers<[1], [0], [0], [1], [0, 0, 1, 1], [], []>} : vector<2x32xf32>, vector<32x32xf32>, vector<2x32xf32> -> vector<2x32xf32>
    %cst_47 = arith.constant dense<0.000000e+00> : vector<2x32xf32>
    %89 = tpu.matmul %85, %27, %cst_47 {dimension_numbers = #tpu.dot_dimension_numbers<[1], [0], [0], [1], [0, 0, 1, 1], [], []>} : vector<2x32xf32>, vector<32x32xf32>, vector<2x32xf32> -> vector<2x32xf32>
    %90 = vector.broadcast %4 : vector<1x32xf32> to vector<2x32xf32>
    %91 = arith.addf %89, %90 : vector<2x32xf32>
    %92 = vector.extract_strided_slice %11 {offsets = [4, 0], sizes = [2, 32], strides = [1, 1]} : vector<16x32xf32> to vector<2x32xf32>
    %93 = arith.addf %92, %87 : vector<2x32xf32>
    %94 = arith.negf %93 : vector<2x32xf32>
    %95 = math.exp %94 : vector<2x32xf32>
    %cst_48 = arith.constant 1.000000e+00 : f32
    %96 = vector.broadcast %cst_48 : f32 to vector<2x32xf32>
    %97 = arith.addf %96, %95 : vector<2x32xf32>
    %98 = arith.divf %96, %97 : vector<2x32xf32>
    %99 = vector.extract_strided_slice %16 {offsets = [4, 0], sizes = [2, 32], strides = [1, 1]} : vector<16x32xf32> to vector<2x32xf32>
    %100 = arith.addf %99, %88 : vector<2x32xf32>
    %101 = arith.negf %100 : vector<2x32xf32>
    %102 = math.exp %101 : vector<2x32xf32>
    %cst_49 = arith.constant 1.000000e+00 : f32
    %103 = vector.broadcast %cst_49 : f32 to vector<2x32xf32>
    %104 = arith.addf %103, %102 : vector<2x32xf32>
    %105 = arith.divf %103, %104 : vector<2x32xf32>
    %106 = vector.extract_strided_slice %21 {offsets = [4, 0], sizes = [2, 32], strides = [1, 1]} : vector<16x32xf32> to vector<2x32xf32>
    %107 = arith.mulf %98, %91 : vector<2x32xf32>
    %108 = arith.addf %106, %107 : vector<2x32xf32>
    %109 = math.tanh %108 : vector<2x32xf32>
    %cst_50 = arith.constant 1.000000e+00 : f32
    %110 = vector.broadcast %cst_50 : f32 to vector<2x32xf32>
    %111 = arith.subf %110, %105 : vector<2x32xf32>
    %112 = arith.mulf %111, %109 : vector<2x32xf32>
    %113 = arith.mulf %105, %85 : vector<2x32xf32>
    %114 = arith.addf %112, %113 : vector<2x32xf32>
    %c4_51 = arith.constant 4 : index
    %c0_52 = arith.constant 0 : index
    %115 = vector.load %arg6[%c4_51, %c0_52] : memref<16x32xf32, #tpu.memory_space<vmem>>, vector<2x32xf32>
    tpu.vector_store %arg6[%c4_51, %c0_52], %114 {strides = array<i32>} : memref<16x32xf32, #tpu.memory_space<vmem>>, vector<2x32xf32>,
    %cst_53 = arith.constant dense<0.000000e+00> : vector<2x32xf32>
    %116 = tpu.matmul %114, %23, %cst_53 {dimension_numbers = #tpu.dot_dimension_numbers<[1], [0], [0], [1], [0, 0, 1, 1], [], []>} : vector<2x32xf32>, vector<32x32xf32>, vector<2x32xf32> -> vector<2x32xf32>
    %cst_54 = arith.constant dense<0.000000e+00> : vector<2x32xf32>
    %117 = tpu.matmul %114, %25, %cst_54 {dimension_numbers = #tpu.dot_dimension_numbers<[1], [0], [0], [1], [0, 0, 1, 1], [], []>} : vector<2x32xf32>, vector<32x32xf32>, vector<2x32xf32> -> vector<2x32xf32>
    %cst_55 = arith.constant dense<0.000000e+00> : vector<2x32xf32>
    %118 = tpu.matmul %114, %27, %cst_55 {dimension_numbers = #tpu.dot_dimension_numbers<[1], [0], [0], [1], [0, 0, 1, 1], [], []>} : vector<2x32xf32>, vector<32x32xf32>, vector<2x32xf32> -> vector<2x32xf32>
    %119 = vector.broadcast %4 : vector<1x32xf32> to vector<2x32xf32>
    %120 = arith.addf %118, %119 : vector<2x32xf32>
    %121 = vector.extract_strided_slice %11 {offsets = [6, 0], sizes = [2, 32], strides = [1, 1]} : vector<16x32xf32> to vector<2x32xf32>
    %122 = arith.addf %121, %116 : vector<2x32xf32>
    %123 = arith.negf %122 : vector<2x32xf32>
    %124 = math.exp %123 : vector<2x32xf32>
    %cst_56 = arith.constant 1.000000e+00 : f32
    %125 = vector.broadcast %cst_56 : f32 to vector<2x32xf32>
    %126 = arith.addf %125, %124 : vector<2x32xf32>
    %127 = arith.divf %125, %126 : vector<2x32xf32>
    %128 = vector.extract_strided_slice %16 {offsets = [6, 0], sizes = [2, 32], strides = [1, 1]} : vector<16x32xf32> to vector<2x32xf32>
    %129 = arith.addf %128, %117 : vector<2x32xf32>
    %130 = arith.negf %129 : vector<2x32xf32>
    %131 = math.exp %130 : vector<2x32xf32>
    %cst_57 = arith.constant 1.000000e+00 : f32
    %132 = vector.broadcast %cst_57 : f32 to vector<2x32xf32>
    %133 = arith.addf %132, %131 : vector<2x32xf32>
    %134 = arith.divf %132, %133 : vector<2x32xf32>
    %135 = vector.extract_strided_slice %21 {offsets = [6, 0], sizes = [2, 32], strides = [1, 1]} : vector<16x32xf32> to vector<2x32xf32>
    %136 = arith.mulf %127, %120 : vector<2x32xf32>
    %137 = arith.addf %135, %136 : vector<2x32xf32>
    %138 = math.tanh %137 : vector<2x32xf32>
    %cst_58 = arith.constant 1.000000e+00 : f32
    %139 = vector.broadcast %cst_58 : f32 to vector<2x32xf32>
    %140 = arith.subf %139, %134 : vector<2x32xf32>
    %141 = arith.mulf %140, %138 : vector<2x32xf32>
    %142 = arith.mulf %134, %114 : vector<2x32xf32>
    %143 = arith.addf %141, %142 : vector<2x32xf32>
    %c6 = arith.constant 6 : index
    %c0_59 = arith.constant 0 : index
    %144 = vector.load %arg6[%c6, %c0_59] : memref<16x32xf32, #tpu.memory_space<vmem>>, vector<2x32xf32>
    tpu.vector_store %arg6[%c6, %c0_59], %143 {strides = array<i32>} : memref<16x32xf32, #tpu.memory_space<vmem>>, vector<2x32xf32>,
    %cst_60 = arith.constant dense<0.000000e+00> : vector<2x32xf32>
    %145 = tpu.matmul %143, %23, %cst_60 {dimension_numbers = #tpu.dot_dimension_numbers<[1], [0], [0], [1], [0, 0, 1, 1], [], []>} : vector<2x32xf32>, vector<32x32xf32>, vector<2x32xf32> -> vector<2x32xf32>
    %cst_61 = arith.constant dense<0.000000e+00> : vector<2x32xf32>
    %146 = tpu.matmul %143, %25, %cst_61 {dimension_numbers = #tpu.dot_dimension_numbers<[1], [0], [0], [1], [0, 0, 1, 1], [], []>} : vector<2x32xf32>, vector<32x32xf32>, vector<2x32xf32> -> vector<2x32xf32>
    %cst_62 = arith.constant dense<0.000000e+00> : vector<2x32xf32>
    %147 = tpu.matmul %143, %27, %cst_62 {dimension_numbers = #tpu.dot_dimension_numbers<[1], [0], [0], [1], [0, 0, 1, 1], [], []>} : vector<2x32xf32>, vector<32x32xf32>, vector<2x32xf32> -> vector<2x32xf32>
    %148 = vector.broadcast %4 : vector<1x32xf32> to vector<2x32xf32>
    %149 = arith.addf %147, %148 : vector<2x32xf32>
    %150 = vector.extract_strided_slice %11 {offsets = [8, 0], sizes = [2, 32], strides = [1, 1]} : vector<16x32xf32> to vector<2x32xf32>
    %151 = arith.addf %150, %145 : vector<2x32xf32>
    %152 = arith.negf %151 : vector<2x32xf32>
    %153 = math.exp %152 : vector<2x32xf32>
    %cst_63 = arith.constant 1.000000e+00 : f32
    %154 = vector.broadcast %cst_63 : f32 to vector<2x32xf32>
    %155 = arith.addf %154, %153 : vector<2x32xf32>
    %156 = arith.divf %154, %155 : vector<2x32xf32>
    %157 = vector.extract_strided_slice %16 {offsets = [8, 0], sizes = [2, 32], strides = [1, 1]} : vector<16x32xf32> to vector<2x32xf32>
    %158 = arith.addf %157, %146 : vector<2x32xf32>
    %159 = arith.negf %158 : vector<2x32xf32>
    %160 = math.exp %159 : vector<2x32xf32>
    %cst_64 = arith.constant 1.000000e+00 : f32
    %161 = vector.broadcast %cst_64 : f32 to vector<2x32xf32>
    %162 = arith.addf %161, %160 : vector<2x32xf32>
    %163 = arith.divf %161, %162 : vector<2x32xf32>
    %164 = vector.extract_strided_slice %21 {offsets = [8, 0], sizes = [2, 32], strides = [1, 1]} : vector<16x32xf32> to vector<2x32xf32>
    %165 = arith.mulf %156, %149 : vector<2x32xf32>
    %166 = arith.addf %164, %165 : vector<2x32xf32>
    %167 = math.tanh %166 : vector<2x32xf32>
    %cst_65 = arith.constant 1.000000e+00 : f32
    %168 = vector.broadcast %cst_65 : f32 to vector<2x32xf32>
    %169 = arith.subf %168, %163 : vector<2x32xf32>
    %170 = arith.mulf %169, %167 : vector<2x32xf32>
    %171 = arith.mulf %163, %143 : vector<2x32xf32>
    %172 = arith.addf %170, %171 : vector<2x32xf32>
    %c8 = arith.constant 8 : index
    %c0_66 = arith.constant 0 : index
    %173 = vector.load %arg6[%c8, %c0_66] : memref<16x32xf32, #tpu.memory_space<vmem>>, vector<2x32xf32>
    tpu.vector_store %arg6[%c8, %c0_66], %172 {strides = array<i32>} : memref<16x32xf32, #tpu.memory_space<vmem>>, vector<2x32xf32>,
    %cst_67 = arith.constant dense<0.000000e+00> : vector<2x32xf32>
    %174 = tpu.matmul %172, %23, %cst_67 {dimension_numbers = #tpu.dot_dimension_numbers<[1], [0], [0], [1], [0, 0, 1, 1], [], []>} : vector<2x32xf32>, vector<32x32xf32>, vector<2x32xf32> -> vector<2x32xf32>
    %cst_68 = arith.constant dense<0.000000e+00> : vector<2x32xf32>
    %175 = tpu.matmul %172, %25, %cst_68 {dimension_numbers = #tpu.dot_dimension_numbers<[1], [0], [0], [1], [0, 0, 1, 1], [], []>} : vector<2x32xf32>, vector<32x32xf32>, vector<2x32xf32> -> vector<2x32xf32>
    %cst_69 = arith.constant dense<0.000000e+00> : vector<2x32xf32>
    %176 = tpu.matmul %172, %27, %cst_69 {dimension_numbers = #tpu.dot_dimension_numbers<[1], [0], [0], [1], [0, 0, 1, 1], [], []>} : vector<2x32xf32>, vector<32x32xf32>, vector<2x32xf32> -> vector<2x32xf32>
    %177 = vector.broadcast %4 : vector<1x32xf32> to vector<2x32xf32>
    %178 = arith.addf %176, %177 : vector<2x32xf32>
    %179 = vector.extract_strided_slice %11 {offsets = [10, 0], sizes = [2, 32], strides = [1, 1]} : vector<16x32xf32> to vector<2x32xf32>
    %180 = arith.addf %179, %174 : vector<2x32xf32>
    %181 = arith.negf %180 : vector<2x32xf32>
    %182 = math.exp %181 : vector<2x32xf32>
    %cst_70 = arith.constant 1.000000e+00 : f32
    %183 = vector.broadcast %cst_70 : f32 to vector<2x32xf32>
    %184 = arith.addf %183, %182 : vector<2x32xf32>
    %185 = arith.divf %183, %184 : vector<2x32xf32>
    %186 = vector.extract_strided_slice %16 {offsets = [10, 0], sizes = [2, 32], strides = [1, 1]} : vector<16x32xf32> to vector<2x32xf32>
    %187 = arith.addf %186, %175 : vector<2x32xf32>
    %188 = arith.negf %187 : vector<2x32xf32>
    %189 = math.exp %188 : vector<2x32xf32>
    %cst_71 = arith.constant 1.000000e+00 : f32
    %190 = vector.broadcast %cst_71 : f32 to vector<2x32xf32>
    %191 = arith.addf %190, %189 : vector<2x32xf32>
    %192 = arith.divf %190, %191 : vector<2x32xf32>
    %193 = vector.extract_strided_slice %21 {offsets = [10, 0], sizes = [2, 32], strides = [1, 1]} : vector<16x32xf32> to vector<2x32xf32>
    %194 = arith.mulf %185, %178 : vector<2x32xf32>
    %195 = arith.addf %193, %194 : vector<2x32xf32>
    %196 = math.tanh %195 : vector<2x32xf32>
    %cst_72 = arith.constant 1.000000e+00 : f32
    %197 = vector.broadcast %cst_72 : f32 to vector<2x32xf32>
    %198 = arith.subf %197, %192 : vector<2x32xf32>
    %199 = arith.mulf %198, %196 : vector<2x32xf32>
    %200 = arith.mulf %192, %172 : vector<2x32xf32>
    %201 = arith.addf %199, %200 : vector<2x32xf32>
    %c10 = arith.constant 10 : index
    %c0_73 = arith.constant 0 : index
    %202 = vector.load %arg6[%c10, %c0_73] : memref<16x32xf32, #tpu.memory_space<vmem>>, vector<2x32xf32>
    tpu.vector_store %arg6[%c10, %c0_73], %201 {strides = array<i32>} : memref<16x32xf32, #tpu.memory_space<vmem>>, vector<2x32xf32>,
    %cst_74 = arith.constant dense<0.000000e+00> : vector<2x32xf32>
    %203 = tpu.matmul %201, %23, %cst_74 {dimension_numbers = #tpu.dot_dimension_numbers<[1], [0], [0], [1], [0, 0, 1, 1], [], []>} : vector<2x32xf32>, vector<32x32xf32>, vector<2x32xf32> -> vector<2x32xf32>
    %cst_75 = arith.constant dense<0.000000e+00> : vector<2x32xf32>
    %204 = tpu.matmul %201, %25, %cst_75 {dimension_numbers = #tpu.dot_dimension_numbers<[1], [0], [0], [1], [0, 0, 1, 1], [], []>} : vector<2x32xf32>, vector<32x32xf32>, vector<2x32xf32> -> vector<2x32xf32>
    %cst_76 = arith.constant dense<0.000000e+00> : vector<2x32xf32>
    %205 = tpu.matmul %201, %27, %cst_76 {dimension_numbers = #tpu.dot_dimension_numbers<[1], [0], [0], [1], [0, 0, 1, 1], [], []>} : vector<2x32xf32>, vector<32x32xf32>, vector<2x32xf32> -> vector<2x32xf32>
    %206 = vector.broadcast %4 : vector<1x32xf32> to vector<2x32xf32>
    %207 = arith.addf %205, %206 : vector<2x32xf32>
    %208 = vector.extract_strided_slice %11 {offsets = [12, 0], sizes = [2, 32], strides = [1, 1]} : vector<16x32xf32> to vector<2x32xf32>
    %209 = arith.addf %208, %203 : vector<2x32xf32>
    %210 = arith.negf %209 : vector<2x32xf32>
    %211 = math.exp %210 : vector<2x32xf32>
    %cst_77 = arith.constant 1.000000e+00 : f32
    %212 = vector.broadcast %cst_77 : f32 to vector<2x32xf32>
    %213 = arith.addf %212, %211 : vector<2x32xf32>
    %214 = arith.divf %212, %213 : vector<2x32xf32>
    %215 = vector.extract_strided_slice %16 {offsets = [12, 0], sizes = [2, 32], strides = [1, 1]} : vector<16x32xf32> to vector<2x32xf32>
    %216 = arith.addf %215, %204 : vector<2x32xf32>
    %217 = arith.negf %216 : vector<2x32xf32>
    %218 = math.exp %217 : vector<2x32xf32>
    %cst_78 = arith.constant 1.000000e+00 : f32
    %219 = vector.broadcast %cst_78 : f32 to vector<2x32xf32>
    %220 = arith.addf %219, %218 : vector<2x32xf32>
    %221 = arith.divf %219, %220 : vector<2x32xf32>
    %222 = vector.extract_strided_slice %21 {offsets = [12, 0], sizes = [2, 32], strides = [1, 1]} : vector<16x32xf32> to vector<2x32xf32>
    %223 = arith.mulf %214, %207 : vector<2x32xf32>
    %224 = arith.addf %222, %223 : vector<2x32xf32>
    %225 = math.tanh %224 : vector<2x32xf32>
    %cst_79 = arith.constant 1.000000e+00 : f32
    %226 = vector.broadcast %cst_79 : f32 to vector<2x32xf32>
    %227 = arith.subf %226, %221 : vector<2x32xf32>
    %228 = arith.mulf %227, %225 : vector<2x32xf32>
    %229 = arith.mulf %221, %201 : vector<2x32xf32>
    %230 = arith.addf %228, %229 : vector<2x32xf32>
    %c12 = arith.constant 12 : index
    %c0_80 = arith.constant 0 : index
    %231 = vector.load %arg6[%c12, %c0_80] : memref<16x32xf32, #tpu.memory_space<vmem>>, vector<2x32xf32>
    tpu.vector_store %arg6[%c12, %c0_80], %230 {strides = array<i32>} : memref<16x32xf32, #tpu.memory_space<vmem>>, vector<2x32xf32>,
    %cst_81 = arith.constant dense<0.000000e+00> : vector<2x32xf32>
    %232 = tpu.matmul %230, %23, %cst_81 {dimension_numbers = #tpu.dot_dimension_numbers<[1], [0], [0], [1], [0, 0, 1, 1], [], []>} : vector<2x32xf32>, vector<32x32xf32>, vector<2x32xf32> -> vector<2x32xf32>
    %cst_82 = arith.constant dense<0.000000e+00> : vector<2x32xf32>
    %233 = tpu.matmul %230, %25, %cst_82 {dimension_numbers = #tpu.dot_dimension_numbers<[1], [0], [0], [1], [0, 0, 1, 1], [], []>} : vector<2x32xf32>, vector<32x32xf32>, vector<2x32xf32> -> vector<2x32xf32>
    %cst_83 = arith.constant dense<0.000000e+00> : vector<2x32xf32>
    %234 = tpu.matmul %230, %27, %cst_83 {dimension_numbers = #tpu.dot_dimension_numbers<[1], [0], [0], [1], [0, 0, 1, 1], [], []>} : vector<2x32xf32>, vector<32x32xf32>, vector<2x32xf32> -> vector<2x32xf32>
    %235 = vector.broadcast %4 : vector<1x32xf32> to vector<2x32xf32>
    %236 = arith.addf %234, %235 : vector<2x32xf32>
    %237 = vector.extract_strided_slice %11 {offsets = [14, 0], sizes = [2, 32], strides = [1, 1]} : vector<16x32xf32> to vector<2x32xf32>
    %238 = arith.addf %237, %232 : vector<2x32xf32>
    %239 = arith.negf %238 : vector<2x32xf32>
    %240 = math.exp %239 : vector<2x32xf32>
    %cst_84 = arith.constant 1.000000e+00 : f32
    %241 = vector.broadcast %cst_84 : f32 to vector<2x32xf32>
    %242 = arith.addf %241, %240 : vector<2x32xf32>
    %243 = arith.divf %241, %242 : vector<2x32xf32>
    %244 = vector.extract_strided_slice %16 {offsets = [14, 0], sizes = [2, 32], strides = [1, 1]} : vector<16x32xf32> to vector<2x32xf32>
    %245 = arith.addf %244, %233 : vector<2x32xf32>
    %246 = arith.negf %245 : vector<2x32xf32>
    %247 = math.exp %246 : vector<2x32xf32>
    %cst_85 = arith.constant 1.000000e+00 : f32
    %248 = vector.broadcast %cst_85 : f32 to vector<2x32xf32>
    %249 = arith.addf %248, %247 : vector<2x32xf32>
    %250 = arith.divf %248, %249 : vector<2x32xf32>
    %251 = vector.extract_strided_slice %21 {offsets = [14, 0], sizes = [2, 32], strides = [1, 1]} : vector<16x32xf32> to vector<2x32xf32>
    %252 = arith.mulf %243, %236 : vector<2x32xf32>
    %253 = arith.addf %251, %252 : vector<2x32xf32>
    %254 = math.tanh %253 : vector<2x32xf32>
    %cst_86 = arith.constant 1.000000e+00 : f32
    %255 = vector.broadcast %cst_86 : f32 to vector<2x32xf32>
    %256 = arith.subf %255, %250 : vector<2x32xf32>
    %257 = arith.mulf %256, %254 : vector<2x32xf32>
    %258 = arith.mulf %250, %230 : vector<2x32xf32>
    %259 = arith.addf %257, %258 : vector<2x32xf32>
    %c14 = arith.constant 14 : index
    %c0_87 = arith.constant 0 : index
    %260 = vector.load %arg6[%c14, %c0_87] : memref<16x32xf32, #tpu.memory_space<vmem>>, vector<2x32xf32>
    tpu.vector_store %arg6[%c14, %c0_87], %259 {strides = array<i32>} : memref<16x32xf32, #tpu.memory_space<vmem>>, vector<2x32xf32>,
    %c0_88 = arith.constant 0 : index
    %c0_89 = arith.constant 0 : index
    %261 = vector.load %arg6[%c0_88, %c0_89] : memref<16x32xf32, #tpu.memory_space<vmem>>, vector<16x32xf32>
    %c3_90 = arith.constant 3 : index
    %c0_91 = arith.constant 0 : index
    %c0_92 = arith.constant 0 : index
    %262 = vector.load %arg2[%c3_90, %c0_91, %c0_92] : memref<5x32x32xf32, #tpu.memory_space<vmem>>, vector<1x32x32xf32>
    %263 = vector.shape_cast %262 : vector<1x32x32xf32> to vector<32x32xf32>
    %cst_93 = arith.constant dense<0.000000e+00> : vector<2x32xf32>
    %264 = tpu.matmul %259, %263, %cst_93 {dimension_numbers = #tpu.dot_dimension_numbers<[1], [0], [0], [1], [0, 0, 1, 1], [], []>} : vector<2x32xf32>, vector<32x32xf32>, vector<2x32xf32> -> vector<2x32xf32>
    %265 = vector.broadcast %5 : vector<1x32xf32> to vector<2x32xf32>
    %266 = arith.addf %264, %265 : vector<2x32xf32>
    %c4_94 = arith.constant 4 : index
    %c0_95 = arith.constant 0 : index
    %c0_96 = arith.constant 0 : index
    %267 = vector.load %arg2[%c4_94, %c0_95, %c0_96] : memref<5x32x32xf32, #tpu.memory_space<vmem>>, vector<1x32x32xf32>
    %268 = vector.shape_cast %267 : vector<1x32x32xf32> to vector<32x32xf32>
    %cst_97 = arith.constant dense<0.000000e+00> : vector<16x32xf32>
    %269 = tpu.matmul %261, %268, %cst_97 {dimension_numbers = #tpu.dot_dimension_numbers<[1], [0], [0], [1], [0, 0, 1, 1], [], []>} : vector<16x32xf32>, vector<32x32xf32>, vector<16x32xf32> -> vector<16x32xf32>
    %270 = tpu.iota {dimensions = array<i32: 0>} : vector<16x2xi32>
    %271 = tpu.iota {dimensions = array<i32: 1>} : vector<16x2xi32>
    %c2_i32 = arith.constant 2 : i32
    %c0_i32 = arith.constant 0 : i32
    %272 = arith.cmpi eq, %c2_i32, %c0_i32 : i32
    %c1_i32 = arith.constant 1 : i32
    %273 = arith.select %272, %c1_i32, %c2_i32 : i32
    %274 = vector.broadcast %273 : i32 to vector<16x2xi32>
    %275 = arith.remsi %270, %274 : vector<16x2xi32>
    %c0_i32_98 = arith.constant 0 : i32
    %276 = vector.broadcast %c0_i32_98 : i32 to vector<16x2xi32>
    %277 = arith.cmpi ne, %275, %276 : vector<16x2xi32>
    %c0_i32_99 = arith.constant 0 : i32
    %278 = vector.broadcast %c0_i32_99 : i32 to vector<16x2xi32>
    %279 = arith.cmpi slt, %275, %278 : vector<16x2xi32>
    %c0_i32_100 = arith.constant 0 : i32
    %280 = arith.cmpi slt, %273, %c0_i32_100 : i32
    %281 = vector.broadcast %280 : i1 to vector<16x2xi1>
    %282 = vector.broadcast %281 : vector<16x2xi1> to vector<16x2xi1>
    %283 = arith.xori %279, %282 : vector<16x2xi1>
    %284 = arith.andi %283, %277 : vector<16x2xi1>
    %285 = vector.broadcast %273 : i32 to vector<16x2xi32>
    %286 = arith.addi %275, %285 : vector<16x2xi32>
    %287 = arith.select %284, %286, %275 : vector<16x2xi1>, vector<16x2xi32>
    %288 = arith.cmpi eq, %287, %271 : vector<16x2xi32>
    %289 = arith.extui %288 : vector<16x2xi1> to vector<16x2xi32>
    %290 = arith.sitofp %289 : vector<16x2xi32> to vector<16x2xf32>
    %cst_101 = arith.constant dense<0.000000e+00> : vector<16x32xf32>
    %291 = tpu.matmul %290, %266, %cst_101 {dimension_numbers = #tpu.dot_dimension_numbers<[1], [0], [0], [1], [0, 0, 1, 1], [], []>} : vector<16x2xf32>, vector<2x32xf32>, vector<16x32xf32> -> vector<16x32xf32>
    %292 = arith.addf %291, %269 : vector<16x32xf32>
    %293 = math.tanh %292 : vector<16x32xf32>
    %294 = vector.broadcast %6 : vector<1x32xf32> to vector<16x32xf32>
    %295 = arith.mulf %293, %294 : vector<16x32xf32>
    %cst_102 = arith.constant dense<0.000000e+00> : vector<16xf32>
    %296 = vector.multi_reduction <add>, %295, %cst_102 [1] : vector<16x32xf32> to vector<16xf32>
    %297 = vector.shape_cast %296 : vector<16xf32> to vector<16x1xf32>
    %298 = vector.shape_cast %297 : vector<16x1xf32> to vector<1x16x1xf32>
    %cst_103 = arith.constant dense<0xFF800000> : vector<1xf32>
    %299 = vector.multi_reduction <maximumf>, %298, %cst_103 [1, 2] : vector<1x16x1xf32> to vector<1xf32>
    %300 = vector.shape_cast %299 : vector<1xf32> to vector<1x1x1xf32>
    %301 = vector.extract %300[0, 0, 0] : f32 from vector<1x1x1xf32>
    %302 = vector.broadcast %301 : f32 to vector<16x1xf32>
    %303 = arith.subf %297, %302 : vector<16x1xf32>
    %304 = math.exp %303 : vector<16x1xf32>
    %305 = tpu.iota {dimensions = array<i32: 0>} : vector<2x16xi32>
    %306 = tpu.iota {dimensions = array<i32: 1>} : vector<2x16xi32>
    %c2_i32_104 = arith.constant 2 : i32
    %c0_i32_105 = arith.constant 0 : i32
    %307 = arith.cmpi eq, %c2_i32_104, %c0_i32_105 : i32
    %c1_i32_106 = arith.constant 1 : i32
    %308 = arith.select %307, %c1_i32_106, %c2_i32_104 : i32
    %309 = vector.broadcast %308 : i32 to vector<2x16xi32>
    %310 = arith.remsi %306, %309 : vector<2x16xi32>
    %c0_i32_107 = arith.constant 0 : i32
    %311 = vector.broadcast %c0_i32_107 : i32 to vector<2x16xi32>
    %312 = arith.cmpi ne, %310, %311 : vector<2x16xi32>
    %c0_i32_108 = arith.constant 0 : i32
    %313 = vector.broadcast %c0_i32_108 : i32 to vector<2x16xi32>
    %314 = arith.cmpi slt, %310, %313 : vector<2x16xi32>
    %c0_i32_109 = arith.constant 0 : i32
    %315 = arith.cmpi slt, %308, %c0_i32_109 : i32
    %316 = vector.broadcast %315 : i1 to vector<2x16xi1>
    %317 = vector.broadcast %316 : vector<2x16xi1> to vector<2x16xi1>
    %318 = arith.xori %314, %317 : vector<2x16xi1>
    %319 = arith.andi %318, %312 : vector<2x16xi1>
    %320 = vector.broadcast %308 : i32 to vector<2x16xi32>
    %321 = arith.addi %310, %320 : vector<2x16xi32>
    %322 = arith.select %319, %321, %310 : vector<2x16xi1>, vector<2x16xi32>
    %323 = arith.cmpi eq, %322, %305 : vector<2x16xi32>
    %324 = arith.extui %323 : vector<2x16xi1> to vector<2x16xi32>
    %325 = arith.sitofp %324 : vector<2x16xi32> to vector<2x16xf32>
    %326 = vector.broadcast %304 : vector<16x1xf32> to vector<16x32xf32>
    %327 = arith.mulf %326, %261 : vector<16x32xf32>
    %cst_110 = arith.constant dense<0.000000e+00> : vector<2x32xf32>
    %328 = tpu.matmul %325, %327, %cst_110 {dimension_numbers = #tpu.dot_dimension_numbers<[1], [0], [0], [1], [0, 0, 1, 1], [], []>} : vector<2x16xf32>, vector<16x32xf32>, vector<2x32xf32> -> vector<2x32xf32>
    %cst_111 = arith.constant dense<0.000000e+00> : vector<2x1xf32>
    %329 = tpu.matmul %325, %304, %cst_111 {dimension_numbers = #tpu.dot_dimension_numbers<[1], [0], [0], [1], [0, 0, 1, 1], [], []>} : vector<2x16xf32>, vector<16x1xf32>, vector<2x1xf32> -> vector<2x1xf32>
    %330 = vector.broadcast %329 : vector<2x1xf32> to vector<2x32xf32>
    %331 = arith.divf %328, %330 : vector<2x32xf32>
    %c0_112 = arith.constant 0 : index
    %c0_113 = arith.constant 0 : index
    %332 = vector.load %arg4[%c0_112, %c0_113] : memref<33x3xf32, #tpu.memory_space<vmem>>, vector<32x3xf32>
    %c32 = arith.constant 32 : index
    %c0_114 = arith.constant 0 : index
    %333 = vector.load %arg4[%c32, %c0_114] : memref<33x3xf32, #tpu.memory_space<vmem>>, vector<1x3xf32>
    %cst_115 = arith.constant dense<0.000000e+00> : vector<2x3xf32>
    %334 = tpu.matmul %331, %332, %cst_115 {dimension_numbers = #tpu.dot_dimension_numbers<[1], [0], [0], [1], [0, 0, 1, 1], [], []>} : vector<2x32xf32>, vector<32x3xf32>, vector<2x3xf32> -> vector<2x3xf32>
    %335 = vector.broadcast %333 : vector<1x3xf32> to vector<2x3xf32>
    %336 = arith.addf %334, %335 : vector<2x3xf32>
    %337 = arith.negf %336 : vector<2x3xf32>
    %338 = math.exp %337 : vector<2x3xf32>
    %cst_116 = arith.constant 1.000000e+00 : f32
    %339 = vector.broadcast %cst_116 : f32 to vector<2x3xf32>
    %340 = arith.addf %339, %338 : vector<2x3xf32>
    %341 = arith.divf %339, %340 : vector<2x3xf32>
    %342 = tpu.iota {dimensions = array<i32: 1>} : vector<2x3xi32>
    %c1_i32_117 = arith.constant 1 : i32
    %343 = vector.broadcast %c1_i32_117 : i32 to vector<2x3xi32>
    %344 = arith.cmpi slt, %342, %343 : vector<2x3xi32>
    %cst_118 = arith.constant 2.000000e+00 : f32
    %345 = vector.broadcast %cst_118 : f32 to vector<2x3xf32>
    %346 = arith.mulf %345, %341 : vector<2x3xf32>
    %cst_119 = arith.constant 1.000000e+00 : f32
    %347 = vector.broadcast %cst_119 : f32 to vector<2x3xf32>
    %348 = arith.subf %346, %347 : vector<2x3xf32>
    %c2_i32_120 = arith.constant 2 : i32
    %349 = vector.broadcast %c2_i32_120 : i32 to vector<2x3xi32>
    %350 = arith.cmpi slt, %342, %349 : vector<2x3xi32>
    %cst_121 = arith.constant 2.000000e+00 : f32
    %351 = vector.broadcast %cst_121 : f32 to vector<2x3xf32>
    %352 = arith.mulf %351, %341 : vector<2x3xf32>
    %cst_122 = arith.constant 1.000000e+00 : f32
    %353 = vector.broadcast %cst_122 : f32 to vector<2x3xf32>
    %354 = arith.subf %352, %353 : vector<2x3xf32>
    %cst_123 = arith.constant 1.000000e+01 : f32
    %355 = vector.broadcast %cst_123 : f32 to vector<2x3xf32>
    %356 = arith.mulf %355, %354 : vector<2x3xf32>
    %cst_124 = arith.constant 1.000000e+01 : f32
    %357 = vector.broadcast %cst_124 : f32 to vector<2x3xf32>
    %358 = arith.mulf %357, %341 : vector<2x3xf32>
    %359 = arith.select %350, %356, %358 : vector<2x3xi1>, vector<2x3xf32>
    %360 = arith.select %344, %348, %359 : vector<2x3xi1>, vector<2x3xf32>
    %c0_125 = arith.constant 0 : index
    %c0_126 = arith.constant 0 : index
    %361 = vector.load %arg5[%c0_125, %c0_126] : memref<2x3xf32, #tpu.memory_space<vmem>>, vector<2x3xf32>
    tpu.vector_store %arg5[%c0_125, %c0_126], %360 {strides = array<i32>} : memref<2x3xf32, #tpu.memory_space<vmem>>, vector<2x3xf32>,
    return
  }
}

</mosaic_0001>

<bundles_post_ra>
// kernel: gru_model_s_month_forward.1
= control target key start
LH: loop header
LB: loop body
LE: loop exit
PB: predicated region body
PF: predicated region fallthrough
CT: control target
= control target key end

     0   :  { %vm41_vm0 = vcmask 1043456   ;;  %vm34_vm1 = vcmask 31744   ;;  %v3733_v12 = vmov 0.0|0.0   ;;  %s4168_s0 = inlined_call_operand.vmem [shape: f32[16,4], index: 0, kind: input, shape index: {}]   ;;  %s4169_s1 = inlined_call_operand.vmem [shape: f32[3,4,32], index: 1, kind: input, shape index: {}]   ;;  %s4170_s2 = inlined_call_operand.vmem [shape: f32[5,32,32], index: 2, kind: input, shape index: {}]   ;;  %s4171_s3 = inlined_call_operand.vmem [shape: f32[8,32], index: 3, kind: input, shape index: {}]   ;;  %s4172_s4 = inlined_call_operand.vmem [shape: f32[33,3], index: 4, kind: input, shape index: {}]   ;;  %s4173_s5 = inlined_call_operand.hbm [shape: f32[2,3], index: 5, kind: output, shape index: {}]  }
   0x1   :  { %v29_v0 = vld [vmem:[%s4169_s1] sm:$0xf]  ;;  %v2873_v1 = vld [vmem:[%s4169_s1 + $0x8] sm:$0xf]  ;;  %v2868_v4 = vld [vmem:[%s4169_s1 + $0x4] sm:$0xf] }
   0x2   :  { %v21_v2 = vld [vmem:[%s4168_s0] sm:$0xff]  ;;  %3103 = vmatprep.subr.msk.mxu1 %vm41_vm0, %v29_v0  ;;  %3113 = vmatprep.subr.msk.mxu0 %vm41_vm0, %v2873_v1  ;;  %v22_v3 = vld [vmem:[%s4168_s0 + $0x8] sm:$0xff]  ;;  %v2880_v10 = vld [vmem:[%s4170_s2 + $0x30] sm:$0xff] }
   0x3   :  { %v2878_v5 = vld [vmem:[%s4170_s2 + $0x20] sm:$0xff]  ;;  %3104 = vmatpush3.msk.msra.mxu1 %vm41_vm0, %v29_v0  ;;  %3105 = vmatprep.mubr.msk.f32.mxu1 %vm34_vm1, %v21_v2  ;;  %v2879_v6 = vld [vmem:[%s4170_s2 + $0x28] sm:$0xff]  ;;  %v2881_v11 = vld [vmem:[%s4170_s2 + $0x38] sm:$0xff] }
   0x4   :  { %v288_v7 = vld [vmem:[%s4170_s2] sm:$0xff]  ;;  %v289_v8 = vld [vmem:[%s4170_s2 + $0x8] sm:$0xff]  ;;  %3114 = vmatpush3.msk.msra.mxu0 %vm41_vm0, %v2873_v1  ;;  %3106 = vmatmul.mubr.msk.f32.vlgmr.msra.gmra.mrb[0].mxu1 %vm34_vm1, %v22_v3  ;;  %v3801_v9 = vpack.c.bf16 %v2879_v6, %v2878_v5 }
   0x5   :  { %3115 = vmatprep.mubr.msk.f32.mxu0 %vm34_vm1, %v21_v2  ;;  %3440 = vmatprep.subr.bf16.mxu0 %v3733_v12  ;;  %v3813_v13 = vpack.c.bf16 %v289_v8, %v288_v7 }
   0x6   :  { %3108 = vmatprep.subr.msk.mxu1 %vm41_vm0, %v2868_v4  ;;  %3116 = vmatmul.mubr.msk.f32.vlgmr.msra.gmra.mrb[0].mxu0 %vm34_vm1, %v22_v3 }
   0x7   :  { %10 = vsyncpa [#allocation4], 0  ;;  %3442 = vmatpush3.bf16.msra.mxu0 %v3801_v9  ;;  %3109 = vmatpush3.msk.msra.mxu1 %vm41_vm0, %v2868_v4  ;;  %v3817_v14 = vpack.c.bf16 %v2881_v11, %v2880_v10  ;;  %v290_v15 = vld [vmem:[%s4170_s2 + $0x10] sm:$0xff]  ;;  %v291_v16 = vld [vmem:[%s4170_s2 + $0x18] sm:$0xff]  ;;  %vm3734_vm2 = vmmov 0   ;;  %v3735_v17 = vmov 0.0  }
   0x8   :  { %3110 = vmatprep.mubr.msk.f32.mxu1 %vm34_vm1, %v21_v2  ;;  %3434 = vmatprep.subr.bf16.mxu1 %v3733_v12  ;;  %v3832_v18 = vpack.c.bf16 %v291_v16, %v290_v15  ;;  %v2882_v19 = vld [vmem:[%s4170_s2 + $0x40] sm:$0xff]  ;;  %v2883_v20 = vld [vmem:[%s4170_s2 + $0x48] sm:$0xff]  ;;  %v2884_v22 = vld [vmem:[%s4170_s2 + $0x50] sm:$0xff]  ;;  %vm302_vm3 = vcmask 261120   ;;  %vm541_vm4 = vcmask 254976   ;;  %vm788_vm5 = vcmask 257026  }
   0x9   :  { %3111 = vmatmul.mubr.msk.f32.vlgmr.msra.gmra.mrb[2].mxu1 %vm34_vm1, %v22_v3  ;;  %3443 = vmatprep.subr.bf16.mxu0 %v3733_v12  ;;  %v3847_v21 = vpack.c.bf16 %v2883_v20, %v2882_v19  ;;  %v2885_v23 = vld [vmem:[%s4170_s2 + $0x58] sm:$0xff]  ;;  %v2864_v25 = vld [vmem:[%s4171_s3] ss:$0 sm:$0xff]  ;;  %v2874_v27 = vld [vmem:[%s4171_s3 + $0x2] ss:$0 sm:$0xff]  ;;  %vm1036_vm6 = vcmask 259076  }
   0xa   :  { %3436 = vmatpush3.bf16.msra.mxu1 %v3813_v13  ;;  %3137 = vmatprep.mubr.msk.f32.mxu0 %vm3734_vm2, %v3735_v17  ;;  %v3862_v24 = vpack.c.bf16 %v2885_v23, %v2884_v22  ;;  %v2869_v31 = vld [vmem:[%s4171_s3 + $0x1] ss:$0 sm:$0xff]  ;;  %v3902_v52 = vld [vmem:[%s4171_s3 + $0x3] ss:$0 sm:$0xff]  ;;  %vm1284_vm7 = vcmask 261126   ;;  %vm2469_vm9 = vcmask 15360  }
   0xb   :  { %3445 = vmatpush3.bf16.msra.mxu0 %v3817_v14  ;;  %3437 = vmatprep.subr.bf16.mxu1 %v3733_v12  ;;  %vm2476_vm11 = vcmask 1041408   ;;  %vm2601_vm13 = vcmask 130048   ;;  %s3737_s9 = smov [#allocation3]   ;;  %vm2848_vm0 = vcmask 17408  }
   0xc   :  { %3126 = vmatprep.mubr.msk.f32.mxu1 %vm3734_vm2, %v3735_v17  ;;  %3452 = vmatprep.subr.bf16.mxu0 %v3733_v12  ;;  %s2856_s1 = sshll.u32 %s3737_s9, 4  ;;  %s2857_s1 = int_to_ptr.vmem [resolvable:$true] %s2856_s1 }
   0xd   :  { %p3714_p1 = scmp.lt.s32.totalorder %s2857_s1, %s2857_s1 }
   0xe   :  { %3439 = vmatpush3.bf16.msra.mxu1 %v3832_v18  ;;  %3138 = vmatmul.mubr.f32.vlgmr.msra.gmra.mrb[2].mxu0 %v3735_v17 }
   0xf   :  { %3446 = vmatprep.subr.bf16.mxu1 %v3733_v12  ;;  %3454 = vmatpush3.bf16.msra.mxu0 %v3813_v13 }
  0x10   :  { %3455 = vmatprep.subr.bf16.mxu0 %v3733_v12  ;;  %3159 = vmatprep.mubr.msk.f32.mxu0 %vm3734_vm2, %v3735_v17 }
  0x11   :  { %3127 = vmatmul.mubr.f32.vlgmr.msra.gmra.mrb[4].mxu1 %v3735_v17 }
  0x12   :  { %3448 = vmatpush3.bf16.msra.mxu1 %v3847_v21  ;;  %3148 = vmatprep.mubr.msk.f32.mxu1 %vm3734_vm2, %v3735_v17 }
  0x13   :  { %3449 = vmatprep.subr.bf16.mxu1 %v3733_v12  ;;  %3457 = vmatpush3.bf16.msra.mxu0 %v3832_v18 }
  0x14   :  { %3464 = vmatprep.subr.bf16.mxu0 %v3733_v12 }
  0x16   :  { %3451 = vmatpush3.bf16.msra.mxu1 %v3862_v24 }
  0x17   :  { %3458 = vmatprep.subr.bf16.mxu1 %v3733_v12 }
  0x19   :  { %3149 = vmatmul.mubr.f32.vlgmr.msra.gmra.mrb[6].mxu1 %v3735_v17 }
  0x1a   :  { %3460 = vmatpush3.bf16.msra.mxu1 %v3801_v9  ;;  %3170 = vmatprep.mubr.msk.f32.mxu1 %vm3734_vm2, %v3735_v17 }
  0x1b   :  { %3461 = vmatprep.subr.bf16.mxu1 %v3733_v12 }
  0x1e   :  { %3463 = vmatpush3.bf16.msra.mxu1 %v3817_v14 }
  0x1f   :  { %3470 = vmatprep.subr.bf16.mxu1 %v3733_v12 }
  0xd7   :  { %v3107_v26 = vpop.f32.mrb[0].mxu1 }
  0xd8   :  { %v3884_v28 = vadd.f32 %v3107_v26, %v2864_v25  ;;  %v111_v29 = vpop.f32.mrb[1].mxu1 }
  0xd9   :  { %v3117_v30 = vpop.f32.mrb[0].mxu0  ;;  %v3893_v39 = vadd.f32 %v2864_v25, %v111_v29 }
  0xda   :  { %v3889_v32 = vadd.f32 %v3117_v30, %v2874_v27  ;;  %v279_v33 = vpop.f32.mrb[1].mxu0 }
  0xdb   :  { %v3905_v56 = vadd.f32 %v2874_v27, %v279_v33 }
  0xdc   :  { %v3112_v34 = vpop.f32.mrb[2].mxu1 }
  0xdd   :  { %v3891_v35 = vadd.f32 %v3112_v34, %v2869_v31  ;;  %v195_v36 = vpop.f32.mrb[3].mxu1 }
  0xde   :  { %v3895_v40 = vadd.f32 %v2869_v31, %v195_v36 }
  0xe1   :  { %v442_v37 = vpop.f32.mrb[2].mxu0 }
  0xe2   :  { %v3139_v38 = vpop.f32.mrb[3].mxu0  ;;  %v527_v45 = vadd.f32 %v442_v37, %v3895_v40 }
  0xe4   :  { %v372_v41 = vpop.f32.mrb[4].mxu1  ;;  %v2888_v46 = vmul.f32 -1.442695, %v527_v45 }
  0xe5   :  { %v520_v42 = vadd.f32 %v372_v41, %v3893_v39  ;;  %v3128_v43 = vpop.f32.mrb[5].mxu1 }
  0xe7   :  { %v2887_v44 = vmul.f32 -1.442695, %v520_v42 }
  0xe9   :  { %3615 = vpow2.f32 %v2887_v44 }
  0xea   :  { %3617 = vpow2.f32 %v2888_v46 }
  0xec   :  { %v516_v47 = vpop.f32.mrb[6].mxu1 }
  0xed   :  { %v3150_v48 = vpop.f32.mrb[7].mxu1  ;;  %v517_v54 = vadd.f32 %v3902_v52, %v516_v47 }
  0xf3   :  { %v3616_v49 = vpop.eup %3615 }
  0xf4   :  { %v524_v50 = vadd.f32 1.0, %v3616_v49  ;;  %v3618_v51 = vpop.eup %3617 }
  0xf5   :  { %v531_v53 = vadd.f32 1.0, %v3618_v51 }
  0xf6   :  { %3619 = vrcp.f32 %v524_v50 }
  0xf7   :  { %3621 = vrcp.f32 %v531_v53 }
 0x100   :  { %v3620_v55 = vpop.eup %3619 }
 0x101   :  { %v534_v57 = vmul.f32 %v3620_v55, %v517_v54  ;;  %v3622_v59 = vpop.eup %3621 }
 0x102   :  { %v537_v60 = vsub.f32 1.0, %v3622_v59  ;;  %v539_v63 = vmul.f32 0.0, %v3622_v59 }
 0x103   :  { %v535_v58 = vadd.f32 %v534_v57, %v3905_v56 }
 0x105   :  { %3623 = vtanh.f32 %v535_v58 }
 0x10f   :  { %v3624_v61 = vpop.eup %3623 }
 0x110   :  { %v538_v62 = vmul.f32 %v3624_v61, %v537_v60 }
 0x112   :  { %v540_v0 = vadd.f32 %v539_v63, %v538_v62 }
 0x114   :  { %542 = vst.msk [vmem:[#allocation2] sm:$0x3] %vm541_vm4, %v540_v0  ;;  %3160 = vmatmul.mubr.msk.f32.vlgmr.msra.gmra.mrb[4].mxu0 %vm302_vm3, %v540_v0  ;;  %3171 = vmatmul.mubr.msk.f32.vlgmr.msra.gmra.mrb[8].mxu1 %vm302_vm3, %v540_v0  ;;  %v784_v29 = vrot.slane %v540_v0, 6 }
 0x115   :  { %3466 = vmatpush3.bf16.msra.mxu0 %v3847_v21  ;;  %3181 = vmatprep.mubr.msk.f32.mxu0 %vm3734_vm2, %v3735_v17 }
 0x116   :  { %3467 = vmatprep.subr.bf16.mxu0 %v3733_v12  ;;  %3472 = vmatpush3.bf16.msra.mxu1 %v3813_v13 }
 0x117   :  { %3473 = vmatprep.subr.bf16.mxu1 %v3733_v12  ;;  %3192 = vmatprep.mubr.msk.f32.mxu1 %vm3734_vm2, %v3735_v17 }
 0x119   :  { %3469 = vmatpush3.bf16.msra.mxu0 %v3862_v24 }
 0x11a   :  { %3476 = vmatprep.subr.bf16.mxu0 %v3733_v12  ;;  %3475 = vmatpush3.bf16.msra.mxu1 %v3832_v18 }
 0x11b   :  { %3482 = vmatprep.subr.bf16.mxu1 %v3733_v12 }
 0x11c   :  { %3182 = vmatmul.mubr.msk.f32.vlgmr.msra.gmra.mrb[6].mxu0 %vm302_vm3, %v540_v0 }
 0x11d   :  { %3478 = vmatpush3.bf16.msra.mxu0 %v3801_v9  ;;  %3203 = vmatprep.mubr.msk.f32.mxu0 %vm3734_vm2, %v3735_v17 }
 0x11e   :  { %3479 = vmatprep.subr.bf16.mxu0 %v3733_v12 }
 0x121   :  { %3481 = vmatpush3.bf16.msra.mxu0 %v3817_v14 }
 0x122   :  { %3488 = vmatprep.subr.bf16.mxu0 %v3733_v12 }
 0x1e7   :  { %v612_v1 = vpop.f32.mrb[4].mxu0  ;;  %v682_v2 = vpop.f32.mrb[8].mxu1 }
 0x1e8   :  { %v757_v3 = vrot.slane %v612_v1, 6  ;;  %v767_v4 = vrot.slane %v682_v2, 6  ;;  %v3161_v5 = vpop.f32.mrb[5].mxu0  ;;  %v3172_v6 = vpop.f32.mrb[9].mxu1 }
 0x1ea   :  { %v759_v7 = vadd.f32 %v757_v3, %v3893_v39  ;;  %v769_v8 = vadd.f32 %v767_v4, %v3895_v40 }
 0x1ec   :  { %v2892_v10 = vmul.f32 -1.442695, %v759_v7  ;;  %v2893_v11 = vmul.f32 -1.442695, %v769_v8 }
 0x1ee   :  { %3625 = vpow2.f32 %v2892_v10 }
 0x1ef   :  { %3627 = vpow2.f32 %v2893_v11  ;;  %v752_v15 = vpop.f32.mrb[6].mxu0 }
 0x1f0   :  { %v3183_v16 = vpop.f32.mrb[7].mxu0  ;;  %v753_v25 = vadd.f32 %v3902_v52, %v752_v15 }
 0x1f2   :  { %v777_v26 = vrot.slane %v753_v25, 6 }
 0x1f8   :  { %v3626_v19 = vpop.eup %3625 }
 0x1f9   :  { %v3628_v20 = vpop.eup %3627  ;;  %v763_v22 = vadd.f32 1.0, %v3626_v19 }
 0x1fa   :  { %v773_v23 = vadd.f32 1.0, %v3628_v20 }
 0x1fb   :  { %3629 = vrcp.f32 %v763_v22 }
 0x1fc   :  { %3631 = vrcp.f32 %v773_v23 }
 0x205   :  { %v3630_v27 = vpop.eup %3629 }
 0x206   :  { %v3632_v30 = vpop.eup %3631  ;;  %v779_v31 = vmul.f32 %v3630_v27, %v777_v26 }
 0x207   :  { %v786_v33 = vmul.f32 %v3632_v30, %v784_v29  ;;  %v782_v36 = vsub.f32 1.0, %v3632_v30 }
 0x208   :  { %v780_v34 = vadd.f32 %v779_v31, %v3905_v56 }
 0x20a   :  { %3633 = vtanh.f32 %v780_v34 }
 0x214   :  { %v3634_v37 = vpop.eup %3633 }
 0x215   :  { %v783_v38 = vmul.f32 %v3634_v37, %v782_v36 }
 0x217   :  { %v787_v41 = vadd.f32 %v786_v33, %v783_v38 }
 0x219   :  { %789 = vst.msk [vmem:[#allocation2] sm:$0xc] %vm788_vm5, %v787_v41  ;;  %v791_v42 = vrot.slane %v787_v41, 2  ;;  %v1032_v0 = vrot.slane %v787_v41, 6 }
 0x21b   :  { %3193 = vmatmul.mubr.msk.f32.vlgmr.msra.gmra.mrb[10].mxu1 %vm302_vm3, %v791_v42  ;;  %3204 = vmatmul.mubr.msk.f32.vlgmr.msra.gmra.mrb[8].mxu0 %vm302_vm3, %v791_v42 }
 0x21c   :  { %3484 = vmatpush3.bf16.msra.mxu1 %v3847_v21  ;;  %3214 = vmatprep.mubr.msk.f32.mxu1 %vm3734_vm2, %v3735_v17 }
 0x21d   :  { %3485 = vmatprep.subr.bf16.mxu1 %v3733_v12  ;;  %3490 = vmatpush3.bf16.msra.mxu0 %v3813_v13 }
 0x21e   :  { %3491 = vmatprep.subr.bf16.mxu0 %v3733_v12  ;;  %3225 = vmatprep.mubr.msk.f32.mxu0 %vm3734_vm2, %v3735_v17 }
 0x220   :  { %3487 = vmatpush3.bf16.msra.mxu1 %v3862_v24 }
 0x221   :  { %3494 = vmatprep.subr.bf16.mxu1 %v3733_v12  ;;  %3493 = vmatpush3.bf16.msra.mxu0 %v3832_v18 }
 0x222   :  { %3500 = vmatprep.subr.bf16.mxu0 %v3733_v12 }
 0x223   :  { %3215 = vmatmul.mubr.msk.f32.vlgmr.msra.gmra.mrb[12].mxu1 %vm302_vm3, %v791_v42 }
 0x224   :  { %3496 = vmatpush3.bf16.msra.mxu1 %v3801_v9  ;;  %3236 = vmatprep.mubr.msk.f32.mxu1 %vm3734_vm2, %v3735_v17 }
 0x225   :  { %3497 = vmatprep.subr.bf16.mxu1 %v3733_v12 }
 0x228   :  { %3499 = vmatpush3.bf16.msra.mxu1 %v3817_v14 }
 0x229   :  { %3506 = vmatprep.subr.bf16.mxu1 %v3733_v12 }
 0x2ee   :  { %v860_v43 = vpop.f32.mrb[10].mxu1  ;;  %v930_v44 = vpop.f32.mrb[8].mxu0 }
 0x2ef   :  { %v1005_v45 = vrot.slane %v860_v43, 4  ;;  %v1015_v46 = vrot.slane %v930_v44, 4  ;;  %v3194_v47 = vpop.f32.mrb[11].mxu1  ;;  %v3205_v48 = vpop.f32.mrb[9].mxu0 }
 0x2f1   :  { %v1007_v49 = vadd.f32 %v1005_v45, %v3893_v39  ;;  %v1017_v50 = vadd.f32 %v1015_v46, %v3895_v40 }
 0x2f3   :  { %v2897_v51 = vmul.f32 -1.442695, %v1007_v49  ;;  %v2898_v53 = vmul.f32 -1.442695, %v1017_v50 }
 0x2f5   :  { %3635 = vpow2.f32 %v2897_v51 }
 0x2f6   :  { %3637 = vpow2.f32 %v2898_v53  ;;  %v1000_v54 = vpop.f32.mrb[12].mxu1 }
 0x2f7   :  { %v3216_v55 = vpop.f32.mrb[13].mxu1  ;;  %v1001_v61 = vadd.f32 %v3902_v52, %v1000_v54 }
 0x2f9   :  { %v1025_v62 = vrot.slane %v1001_v61, 4 }
 0x2ff   :  { %v3636_v57 = vpop.eup %3635 }
 0x300   :  { %v3638_v58 = vpop.eup %3637  ;;  %v1011_v59 = vadd.f32 1.0, %v3636_v57 }
 0x301   :  { %v1021_v60 = vadd.f32 1.0, %v3638_v58 }
 0x302   :  { %3639 = vrcp.f32 %v1011_v59 }
 0x303   :  { %3641 = vrcp.f32 %v1021_v60 }
 0x30c   :  { %v3640_v63 = vpop.eup %3639 }
 0x30d   :  { %v3642_v1 = vpop.eup %3641  ;;  %v1027_v2 = vmul.f32 %v3640_v63, %v1025_v62 }
 0x30e   :  { %v1034_v3 = vmul.f32 %v3642_v1, %v1032_v0  ;;  %v1030_v5 = vsub.f32 1.0, %v3642_v1 }
 0x30f   :  { %v1028_v4 = vadd.f32 %v1027_v2, %v3905_v56 }
 0x311   :  { %3643 = vtanh.f32 %v1028_v4 }
 0x31b   :  { %v3644_v6 = vpop.eup %3643 }
 0x31c   :  { %v1031_v7 = vmul.f32 %v3644_v6, %v1030_v5 }
 0x31e   :  { %v1035_v8 = vadd.f32 %v1034_v3, %v1031_v7 }
 0x320   :  { %1037 = vst.msk [vmem:[#allocation2] sm:$0x30] %vm1036_vm6, %v1035_v8  ;;  %v1039_v10 = vrot.slane %v1035_v8, 4  ;;  %v1280_v42 = vrot.slane %v1035_v8, 6 }
 0x322   :  { %3226 = vmatmul.mubr.msk.f32.vlgmr.msra.gmra.mrb[10].mxu0 %vm302_vm3, %v1039_v10  ;;  %3237 = vmatmul.mubr.msk.f32.vlgmr.msra.gmra.mrb[14].mxu1 %vm302_vm3, %v1039_v10 }
 0x323   :  { %3502 = vmatpush3.bf16.msra.mxu0 %v3847_v21  ;;  %3247 = vmatprep.mubr.msk.f32.mxu0 %vm3734_vm2, %v3735_v17 }
 0x324   :  { %3503 = vmatprep.subr.bf16.mxu0 %v3733_v12  ;;  %3508 = vmatpush3.bf16.msra.mxu1 %v3813_v13 }
 0x325   :  { %3509 = vmatprep.subr.bf16.mxu1 %v3733_v12  ;;  %3258 = vmatprep.mubr.msk.f32.mxu1 %vm3734_vm2, %v3735_v17 }
 0x327   :  { %3505 = vmatpush3.bf16.msra.mxu0 %v3862_v24 }
 0x328   :  { %3512 = vmatprep.subr.bf16.mxu0 %v3733_v12  ;;  %3511 = vmatpush3.bf16.msra.mxu1 %v3832_v18 }
 0x329   :  { %3518 = vmatprep.subr.bf16.mxu1 %v3733_v12 }
 0x32a   :  { %3248 = vmatmul.mubr.msk.f32.vlgmr.msra.gmra.mrb[12].mxu0 %vm302_vm3, %v1039_v10 }
 0x32b   :  { %3514 = vmatpush3.bf16.msra.mxu0 %v3801_v9  ;;  %3269 = vmatprep.mubr.msk.f32.mxu0 %vm3734_vm2, %v3735_v17 }
 0x32c   :  { %3515 = vmatprep.subr.bf16.mxu0 %v3733_v12 }
 0x32f   :  { %3517 = vmatpush3.bf16.msra.mxu0 %v3817_v14 }
 0x330   :  { %3524 = vmatprep.subr.bf16.mxu0 %v3733_v12 }
 0x3f5   :  { %v1108_v11 = vpop.f32.mrb[10].mxu0  ;;  %v1178_v15 = vpop.f32.mrb[14].mxu1 }
 0x3f6   :  { %v1253_v16 = vrot.slane %v1108_v11, 2  ;;  %v1263_v19 = vrot.slane %v1178_v15, 2  ;;  %v3227_v20 = vpop.f32.mrb[11].mxu0  ;;  %v3238_v22 = vpop.f32.mrb[15].mxu1 }
 0x3f8   :  { %v1255_v23 = vadd.f32 %v1253_v16, %v3893_v39  ;;  %v1265_v25 = vadd.f32 %v1263_v19, %v3895_v40 }
 0x3fa   :  { %v2902_v26 = vmul.f32 -1.442695, %v1255_v23  ;;  %v2903_v27 = vmul.f32 -1.442695, %v1265_v25 }
 0x3fc   :  { %3645 = vpow2.f32 %v2902_v26 }
 0x3fd   :  { %3647 = vpow2.f32 %v2903_v27  ;;  %v1248_v29 = vpop.f32.mrb[12].mxu0 }
 0x3fe   :  { %v3249_v30 = vpop.f32.mrb[13].mxu0  ;;  %v1249_v37 = vadd.f32 %v3902_v52, %v1248_v29 }
 0x400   :  { %v1273_v38 = vrot.slane %v1249_v37, 2 }
 0x406   :  { %v3646_v31 = vpop.eup %3645 }
 0x407   :  { %v3648_v33 = vpop.eup %3647  ;;  %v1259_v34 = vadd.f32 1.0, %v3646_v31 }
 0x408   :  { %v1269_v36 = vadd.f32 1.0, %v3648_v33 }
 0x409   :  { %3649 = vrcp.f32 %v1259_v34 }
 0x40a   :  { %3651 = vrcp.f32 %v1269_v36 }
 0x413   :  { %v3650_v41 = vpop.eup %3649 }
 0x414   :  { %v3652_v39 = vpop.eup %3651  ;;  %v1275_v43 = vmul.f32 %v3650_v41, %v1273_v38 }
 0x415   :  { %v1282_v40 = vmul.f32 %v3652_v39, %v1280_v42  ;;  %v1278_v45 = vsub.f32 1.0, %v3652_v39 }
 0x416   :  { %v1276_v44 = vadd.f32 %v1275_v43, %v3905_v56 }
 0x418   :  { %3653 = vtanh.f32 %v1276_v44 }
 0x422   :  { %v3654_v46 = vpop.eup %3653 }
 0x423   :  { %v1279_v47 = vmul.f32 %v3654_v46, %v1278_v45 }
 0x425   :  { %v1283_v48 = vadd.f32 %v1282_v40, %v1279_v47 }
 0x427   :  { %1285 = vst.msk [vmem:[#allocation2] sm:$0xc0] %vm1284_vm7, %v1283_v48  ;;  %v1287_v49 = vrot.slane %v1283_v48, 6 }
 0x429   :  { %3259 = vmatmul.mubr.msk.f32.vlgmr.msra.gmra.mrb[16].mxu1 %vm302_vm3, %v1287_v49  ;;  %3270 = vmatmul.mubr.msk.f32.vlgmr.msra.gmra.mrb[14].mxu0 %vm302_vm3, %v1287_v49 }
 0x42a   :  { %3520 = vmatpush3.bf16.msra.mxu1 %v3847_v21  ;;  %3280 = vmatprep.mubr.msk.f32.mxu1 %vm3734_vm2, %v3735_v17 }
 0x42b   :  { %3521 = vmatprep.subr.bf16.mxu1 %v3733_v12  ;;  %3526 = vmatpush3.bf16.msra.mxu0 %v3813_v13 }
 0x42c   :  { %3527 = vmatprep.subr.bf16.mxu0 %v3733_v12  ;;  %3291 = vmatprep.mubr.msk.f32.mxu0 %vm3734_vm2, %v3735_v17 }
 0x42e   :  { %3523 = vmatpush3.bf16.msra.mxu1 %v3862_v24 }
 0x42f   :  { %3530 = vmatprep.subr.bf16.mxu1 %v3733_v12  ;;  %3529 = vmatpush3.bf16.msra.mxu0 %v3832_v18 }
 0x430   :  { %3536 = vmatprep.subr.bf16.mxu0 %v3733_v12 }
 0x431   :  { %3281 = vmatmul.mubr.msk.f32.vlgmr.msra.gmra.mrb[18].mxu1 %vm302_vm3, %v1287_v49 }
 0x432   :  { %3532 = vmatpush3.bf16.msra.mxu1 %v3801_v9  ;;  %3302 = vmatprep.mubr.msk.f32.mxu1 %vm3734_vm2, %v3735_v17 }
 0x433   :  { %3533 = vmatprep.subr.bf16.mxu1 %v3733_v12 }
 0x436   :  { %3535 = vmatpush3.bf16.msra.mxu1 %v3817_v14 }
 0x437   :  { %3542 = vmatprep.subr.bf16.mxu1 %v3733_v12 }
 0x4fc   :  { %v1356_v56 = vpop.f32.mrb[16].mxu1  ;;  %v1426_v50 = vpop.f32.mrb[14].mxu0 }
 0x4fd   :  { %v1500_v51 = vadd.f32 %v1356_v56, %v3884_v28  ;;  %v3260_v53 = vpop.f32.mrb[17].mxu1  ;;  %v3271_v54 = vpop.f32.mrb[15].mxu0  ;;  %v1507_v57 = vadd.f32 %v1426_v50, %v3891_v35 }
 0x4ff   :  { %v2907_v55 = vmul.f32 -1.442695, %v1500_v51  ;;  %v2908_v58 = vmul.f32 -1.442695, %v1507_v57 }
 0x501   :  { %3655 = vpow2.f32 %v2907_v55 }
 0x502   :  { %3657 = vpow2.f32 %v2908_v58 }
 0x504   :  { %v1496_v59 = vpop.f32.mrb[18].mxu1 }
 0x505   :  { %v3282_v60 = vpop.f32.mrb[19].mxu1  ;;  %v1497_v1 = vadd.f32 %v3902_v52, %v1496_v59 }
 0x50b   :  { %v3656_v61 = vpop.eup %3655 }
 0x50c   :  { %v1504_v62 = vadd.f32 1.0, %v3656_v61  ;;  %v3658_v63 = vpop.eup %3657 }
 0x50d   :  { %v1511_v0 = vadd.f32 1.0, %v3658_v63 }
 0x50e   :  { %3659 = vrcp.f32 %v1504_v62 }
 0x50f   :  { %3661 = vrcp.f32 %v1511_v0 }
 0x518   :  { %v3660_v2 = vpop.eup %3659 }
 0x519   :  { %v1514_v3 = vmul.f32 %v3660_v2, %v1497_v1  ;;  %v3662_v5 = vpop.eup %3661 }
 0x51a   :  { %v1517_v6 = vsub.f32 1.0, %v3662_v5  ;;  %v1520_v10 = vmul.f32 %v3662_v5, %v1287_v49 }
 0x51b   :  { %v1515_v4 = vadd.f32 %v1514_v3, %v3889_v32 }
 0x51d   :  { %3663 = vtanh.f32 %v1515_v4 }
 0x527   :  { %v3664_v7 = vpop.eup %3663 }
 0x528   :  { %v1518_v8 = vmul.f32 %v3664_v7, %v1517_v6 }
 0x52a   :  { %v1521_v11 = vadd.f32 %v1520_v10, %v1518_v8 }
 0x52c   :  { %1522 = vst.msk [vmem:[#allocation2 + $0x8] sm:$0x3] %vm541_vm4, %v1521_v11  ;;  %3292 = vmatmul.mubr.msk.f32.vlgmr.msra.gmra.mrb[16].mxu0 %vm302_vm3, %v1521_v11  ;;  %3303 = vmatmul.mubr.msk.f32.vlgmr.msra.gmra.mrb[20].mxu1 %vm302_vm3, %v1521_v11  ;;  %v1764_v39 = vrot.slane %v1521_v11, 6 }
 0x52d   :  { %3538 = vmatpush3.bf16.msra.mxu0 %v3847_v21  ;;  %3313 = vmatprep.mubr.msk.f32.mxu0 %vm3734_vm2, %v3735_v17 }
 0x52e   :  { %3539 = vmatprep.subr.bf16.mxu0 %v3733_v12  ;;  %3544 = vmatpush3.bf16.msra.mxu1 %v3813_v13 }
 0x52f   :  { %3545 = vmatprep.subr.bf16.mxu1 %v3733_v12  ;;  %3324 = vmatprep.mubr.msk.f32.mxu1 %vm3734_vm2, %v3735_v17 }
 0x531   :  { %3541 = vmatpush3.bf16.msra.mxu0 %v3862_v24 }
 0x532   :  { %3548 = vmatprep.subr.bf16.mxu0 %v3733_v12  ;;  %3547 = vmatpush3.bf16.msra.mxu1 %v3832_v18 }
 0x533   :  { %3554 = vmatprep.subr.bf16.mxu1 %v3733_v12 }
 0x534   :  { %3314 = vmatmul.mubr.msk.f32.vlgmr.msra.gmra.mrb[18].mxu0 %vm302_vm3, %v1521_v11 }
 0x535   :  { %3550 = vmatpush3.bf16.msra.mxu0 %v3801_v9  ;;  %3335 = vmatprep.mubr.msk.f32.mxu0 %vm3734_vm2, %v3735_v17 }
 0x536   :  { %3551 = vmatprep.subr.bf16.mxu0 %v3733_v12 }
 0x539   :  { %3553 = vmatpush3.bf16.msra.mxu0 %v3817_v14 }
 0x53a   :  { %3560 = vmatprep.subr.bf16.mxu0 %v3733_v12 }
 0x5ff   :  { %v1592_v15 = vpop.f32.mrb[16].mxu0  ;;  %v1662_v16 = vpop.f32.mrb[20].mxu1 }
 0x600   :  { %v1737_v19 = vrot.slane %v1592_v15, 6  ;;  %v1747_v20 = vrot.slane %v1662_v16, 6  ;;  %v3293_v22 = vpop.f32.mrb[17].mxu0  ;;  %v3304_v23 = vpop.f32.mrb[21].mxu1 }
 0x601   :  { %v2926_v22 = vld [vmem:[%s4170_s2 + $0x70] sm:$0xff]  ;;  %v2927_v23 = vld [vmem:[%s4170_s2 + $0x78] sm:$0xff] }
 0x602   :  { %v1739_v25 = vadd.f32 %v1737_v19, %v3884_v28  ;;  %v1749_v26 = vadd.f32 %v1747_v20, %v3891_v35  ;;  %v4075_v19 = vld [vmem:[#allocation2] sm:$0xff]  ;;  %v2925_v20 = vld [vmem:[%s4170_s2 + $0x68] sm:$0xff] }
 0x604   :  { %v2912_v27 = vmul.f32 -1.442695, %v1739_v25  ;;  %v2913_v29 = vmul.f32 -1.442695, %v1749_v26  ;;  %v2930_v25 = vld [vmem:[%s4170_s2 + $0x80] sm:$0xff]  ;;  %v2931_v26 = vld [vmem:[%s4170_s2 + $0x88] sm:$0xff] }
 0x606   :  { %3665 = vpow2.f32 %v2912_v27  ;;  %v3584_v27 = vpack.c.bf16 %v2931_v26, %v2930_v25 }
 0x607   :  { %3667 = vpow2.f32 %v2913_v29  ;;  %v1732_v30 = vpop.f32.mrb[18].mxu0  ;;  %v3582_v29 = vpack.c.bf16 %v2927_v23, %v2926_v22 }
 0x608   :  { %v3315_v31 = vpop.f32.mrb[19].mxu0  ;;  %v1733_v38 = vadd.f32 %v3902_v52, %v1732_v30  ;;  %v2932_v30 = vld [vmem:[%s4170_s2 + $0x90] sm:$0xff] }
 0x609   :  { %v2933_v31 = vld [vmem:[%s4170_s2 + $0x98] sm:$0xff] }
 0x60a   :  { %v1757_v41 = vrot.slane %v1733_v38, 6 }
 0x610   :  { %v3666_v33 = vpop.eup %3665 }
 0x611   :  { %v3668_v34 = vpop.eup %3667  ;;  %v1743_v36 = vadd.f32 1.0, %v3666_v33  ;;  %v3588_v33 = vpack.c.bf16 %v2933_v31, %v2932_v30 }
 0x612   :  { %v1753_v37 = vadd.f32 1.0, %v3668_v34 }
 0x613   :  { %3669 = vrcp.f32 %v1743_v36 }
 0x614   :  { %3671 = vrcp.f32 %v1753_v37 }
 0x61d   :  { %v3670_v42 = vpop.eup %3669 }
 0x61e   :  { %v3672_v43 = vpop.eup %3671  ;;  %v1759_v40 = vmul.f32 %v3670_v42, %v1757_v41 }
 0x61f   :  { %v1766_v44 = vmul.f32 %v3672_v43, %v1764_v39  ;;  %v1762_v46 = vsub.f32 1.0, %v3672_v43 }
 0x620   :  { %v1760_v45 = vadd.f32 %v1759_v40, %v3889_v32 }
 0x622   :  { %3673 = vtanh.f32 %v1760_v45 }
 0x62c   :  { %v3674_v47 = vpop.eup %3673 }
 0x62d   :  { %v1763_v48 = vmul.f32 %v3674_v47, %v1762_v46 }
 0x62f   :  { %v1767_v49 = vadd.f32 %v1766_v44, %v1763_v48 }
 0x631   :  { %1768 = vst.msk [vmem:[#allocation2 + $0x8] sm:$0xc] %vm788_vm5, %v1767_v49  ;;  %v1770_v56 = vrot.slane %v1767_v49, 2  ;;  %v2011_v3 = vrot.slane %v1767_v49, 6 }
 0x633   :  { %3325 = vmatmul.mubr.msk.f32.vlgmr.msra.gmra.mrb[22].mxu1 %vm302_vm3, %v1770_v56  ;;  %3336 = vmatmul.mubr.msk.f32.vlgmr.msra.gmra.mrb[20].mxu0 %vm302_vm3, %v1770_v56 }
 0x634   :  { %3556 = vmatpush3.bf16.msra.mxu1 %v3847_v21  ;;  %3346 = vmatprep.mubr.msk.f32.mxu1 %vm3734_vm2, %v3735_v17 }
 0x635   :  { %3557 = vmatprep.subr.bf16.mxu1 %v3733_v12  ;;  %3562 = vmatpush3.bf16.msra.mxu0 %v3813_v13 }
 0x636   :  { %3563 = vmatprep.subr.bf16.mxu0 %v3733_v12  ;;  %3357 = vmatprep.mubr.msk.f32.mxu0 %vm3734_vm2, %v3735_v17 }
 0x638   :  { %3559 = vmatpush3.bf16.msra.mxu1 %v3862_v24 }
 0x639   :  { %3566 = vmatprep.subr.bf16.mxu1 %v3733_v12  ;;  %3565 = vmatpush3.bf16.msra.mxu0 %v3832_v18 }
 0x63a   :  { %3572 = vmatprep.subr.bf16.mxu0 %v3733_v12 }
 0x63b   :  { %3347 = vmatmul.mubr.msk.f32.vlgmr.msra.gmra.mrb[24].mxu1 %vm302_vm3, %v1770_v56 }
 0x63c   :  { %3568 = vmatpush3.bf16.msra.mxu1 %v3801_v9  ;;  %3368 = vmatprep.mubr.msk.f32.mxu1 %vm3734_vm2, %v3735_v17 }
 0x63d   :  { %3569 = vmatprep.subr.bf16.mxu1 %v3733_v12 }
 0x640   :  { %3571 = vmatpush3.bf16.msra.mxu1 %v3817_v14 }
 0x641   :  { %3578 = vmatprep.subr.bf16.mxu1 %v3733_v12 }
 0x706   :  { %v1839_v13 = vpop.f32.mrb[22].mxu1  ;;  %v1909_v50 = vpop.f32.mrb[20].mxu0 }
 0x707   :  { %v1984_v51 = vrot.slane %v1839_v13, 4  ;;  %v1994_v53 = vrot.slane %v1909_v50, 4  ;;  %v3326_v18 = vpop.f32.mrb[23].mxu1  ;;  %v3337_v54 = vpop.f32.mrb[21].mxu0 }
 0x709   :  { %v1986_v55 = vadd.f32 %v1984_v51, %v3884_v28  ;;  %v1996_v57 = vadd.f32 %v1994_v53, %v3891_v35 }
 0x70b   :  { %v2917_v9 = vmul.f32 -1.442695, %v1986_v55  ;;  %v2918_v58 = vmul.f32 -1.442695, %v1996_v57 }
 0x70d   :  { %3675 = vpow2.f32 %v2917_v9 }
 0x70e   :  { %3677 = vpow2.f32 %v2918_v58  ;;  %v1979_v59 = vpop.f32.mrb[24].mxu1 }
 0x70f   :  { %v3348_v60 = vpop.f32.mrb[25].mxu1  ;;  %v1980_v0 = vadd.f32 %v3902_v52, %v1979_v59 }
 0x710   :  { %v2434_v60 = vlaneseq }
 0x711   :  { %v2004_v1 = vrot.slane %v1980_v0, 4 }
 0x717   :  { %v3676_v61 = vpop.eup %3675 }
 0x718   :  { %v3678_v14 = vpop.eup %3677  ;;  %v1990_v62 = vadd.f32 1.0, %v3676_v61  ;;  %v2435_v61 = vshrl.u32 %v2434_v60, 7 }
 0x719   :  { %v2000_v63 = vadd.f32 1.0, %v3678_v14  ;;  %v4114_v14 = vand.u32 127, %v2434_v60 }
 0x71a   :  { %3679 = vrcp.f32 %v1990_v62 }
 0x71b   :  { %3681 = vrcp.f32 %v2000_v63  ;;  %v2436_v63 = vadd.s32 8, %v2435_v61  ;;  %vm2843_vm14 = vcmp.lt.s32.totalorder %v4114_v14, 2  ;;  %vm2840_vm15 = vcmp.lt.s32.totalorder %v4114_v14, 1 }
 0x71d   :  { %v2450_v0 = vand.u32 1, %v2436_v63 }
 0x71f   :  { %vm2464_vm10 = vcmp.eq.s32.totalorder %v2450_v0, %v4114_v14 }
 0x724   :  { %v3680_v2 = vpop.eup %3679 }
 0x725   :  { %v3682_v4 = vpop.eup %3681  ;;  %v2006_v5 = vmul.f32 %v3680_v2, %v2004_v1  ;;  %v2928_v1 = vld [vmem:[%s4171_s3 + $0x4] ss:$0 sm:$0xff] }
 0x726   :  { %v2013_v6 = vmul.f32 %v3682_v4, %v2011_v3  ;;  %v2009_v8 = vsub.f32 1.0, %v3682_v4 }
 0x727   :  { %v2007_v7 = vadd.f32 %v2006_v5, %v3889_v32  ;;  %v2937_v5 = vsel %vm2464_vm10, 1.0, %v3735_v17 }
 0x729   :  { %3683 = vtanh.f32 %v2007_v7 }
 0x733   :  { %v3684_v10 = vpop.eup %3683 }
 0x734   :  { %v2010_v11 = vmul.f32 %v3684_v10, %v2009_v8  ;;  %v2941_v8 = vld [vmem:[%s4171_s3 + $0x5] ss:$0 sm:$0xff] }
 0x736   :  { %v2014_v15 = vadd.f32 %v2013_v6, %v2010_v11 }
 0x738   :  { %2015 = vst.msk [vmem:[#allocation2 + $0x8] sm:$0x30] %vm1036_vm6, %v2014_v15  ;;  %v2017_v16 = vrot.slane %v2014_v15, 4  ;;  %v2258_v53 = vrot.slane %v2014_v15, 6 }
 0x73a   :  { %3358 = vmatmul.mubr.msk.f32.vlgmr.msra.gmra.mrb[22].mxu0 %vm302_vm3, %v2017_v16  ;;  %3369 = vmatmul.mubr.msk.f32.vlgmr.msra.gmra.mrb[26].mxu1 %vm302_vm3, %v2017_v16 }
 0x73b   :  { %3574 = vmatpush3.bf16.msra.mxu0 %v3847_v21  ;;  %3379 = vmatprep.mubr.msk.f32.mxu0 %vm3734_vm2, %v3735_v17  ;;  %v2924_v21 = vld [vmem:[%s4170_s2 + $0x60] sm:$0xff] }
 0x73c   :  { %3575 = vmatprep.subr.bf16.mxu0 %v3733_v12  ;;  %3390 = vmatprep.mubr.msk.f32.mxu1 %vm3734_vm2, %v3735_v17 }
 0x73f   :  { %3577 = vmatpush3.bf16.msra.mxu0 %v3862_v24  ;;  %v3579_v24 = vpack.c.bf16 %v2925_v20, %v2924_v21 }
 0x740   :  { %3585 = vmatprep.subr.bf16.mxu0 %v3584_v27 }
 0x741   :  { %3580 = vmatpush3.bf16.msra.mxu1 %v3579_v24 }
 0x742   :  { %3380 = vmatmul.mubr.msk.f32.vlgmr.msra.gmra.mrb[24].mxu0 %vm302_vm3, %v2017_v16  ;;  %3581 = vmatprep.subr.bf16.mxu1 %v3733_v12 }
 0x743   :  { %3401 = vmatprep.mubr.msk.f32.mxu0 %vm302_vm3, %v4075_v19  ;;  %3587 = vmatpush3.bf16.msra.mxu0 %v3584_v27 }
 0x744   :  { %3589 = vmatprep.subr.bf16.mxu0 %v3588_v33 }
 0x745   :  { %3583 = vmatpush3.bf16.msra.mxu1 %v3582_v29 }
 0x746   :  { %3592 = vmatprep.subr.bf16.mxu1 %v3733_v12 }
 0x747   :  { %3591 = vmatpush3.bf16.msra.mxu0 %v3588_v33 }
 0x80d   :  { %v2086_v34 = vpop.f32.mrb[22].mxu0  ;;  %v2156_v36 = vpop.f32.mrb[26].mxu1 }
 0x80e   :  { %v2231_v37 = vrot.slane %v2086_v34, 2  ;;  %v2241_v38 = vrot.slane %v2156_v36, 2  ;;  %v3359_v41 = vpop.f32.mrb[23].mxu0  ;;  %v3370_v42 = vpop.f32.mrb[27].mxu1 }
 0x80f   :  { %v2588_v41 = vand.u32 1, %v4114_v14 }
 0x810   :  { %v2233_v39 = vadd.f32 %v2231_v37, %v3884_v28  ;;  %v2243_v43 = vadd.f32 %v2241_v38, %v3891_v35 }
 0x811   :  { %vm2596_vm12 = vcmp.eq.s32.totalorder %v2588_v41, %v2435_v61 }
 0x812   :  { %v2922_v40 = vmul.f32 -1.442695, %v2233_v39  ;;  %v2923_v44 = vmul.f32 -1.442695, %v2243_v43 }
 0x814   :  { %3685 = vpow2.f32 %v2922_v40 }
 0x815   :  { %3687 = vpow2.f32 %v2923_v44  ;;  %v2226_v45 = vpop.f32.mrb[24].mxu0 }
 0x816   :  { %v3381_v46 = vpop.f32.mrb[25].mxu0  ;;  %v2227_v13 = vadd.f32 %v3902_v52, %v2226_v45  ;;  %v2942_v45 = vsel %vm2596_vm12, 1.0, %v3735_v17 }
 0x818   :  { %v2251_v50 = vrot.slane %v2227_v13, 2  ;;  %v2752_v13 = vld [vmem:[%s4172_s4] sm:$0xff] }
 0x81e   :  { %v3686_v47 = vpop.eup %3685 }
 0x81f   :  { %v3688_v48 = vpop.eup %3687  ;;  %v2237_v49 = vadd.f32 1.0, %v3686_v47  ;;  %v3736_v47 = vmov 0  }
 0x820   :  { %v2247_v56 = vadd.f32 1.0, %v3688_v48  ;;  %3613 = vset.pattern.permute.xlu1 %v3736_v47  ;;  %3614 = vset.pattern.permute.xlu0 %v3736_v47 }
 0x821   :  { %3689 = vrcp.f32 %v2237_v49 }
 0x822   :  { %3691 = vrcp.f32 %v2247_v56 }
 0x82b   :  { %v3690_v51 = vpop.eup %3689 }
 0x82c   :  { %v3692_v28 = vpop.eup %3691  ;;  %v2253_v18 = vmul.f32 %v3690_v51, %v2251_v50  ;;  %v2753_v50 = vld [vmem:[%s4172_s4 + $0x8] sm:$0xff] }
 0x82d   :  { %v2260_v35 = vmul.f32 %v3692_v28, %v2258_v53  ;;  %v2256_v55 = vsub.f32 1.0, %v3692_v28  ;;  %v3599_v51 = vpack.c.bf16 %v2753_v50, %v2752_v13  ;;  %v2755_v53 = vld [vmem:[%s4172_s4 + $0x18] sm:$0xff] }
 0x82e   :  { %v2254_v54 = vadd.f32 %v2253_v18, %v3889_v32  ;;  %v2443_v32 = vand.u32 1, %v2435_v61 }
 0x830   :  { %3693 = vtanh.f32 %v2254_v54  ;;  %vm2463_vm8 = vcmp.eq.s32.totalorder %v2443_v32, %v4114_v14 }
 0x831   :  { %v2936_v62 = vsel %vm2463_vm8, 1.0, %v3735_v17 }
 0x83a   :  { %v3694_v57 = vpop.eup %3693 }
 0x83b   :  { %v2257_v9 = vmul.f32 %v3694_v57, %v2256_v55 }
 0x83d   :  { %v2261_v58 = vadd.f32 %v2260_v35, %v2257_v9 }
 0x83f   :  { %2262 = vst.msk [vmem:[#allocation2 + $0x8] sm:$0xc0] %vm1284_vm7, %v2261_v58  ;;  %v2275_v59 = vrot.slane %v2261_v58, 6 }
 0x841   :  { %3391 = vmatmul.mubr.msk.f32.vlgmr.msra.gmra.mrb[28].mxu1 %vm302_vm3, %v2275_v59 }
 0x842   :  { %3413 = vmatprep.mubr.msk.f32.mxu1 %vm3734_vm2, %v3735_v17 }
 0x846   :  { %v2264_v52 = vld [vmem:[#allocation2 + $0x8] sm:$0xff] }
 0x847   :  { %3402 = vmatmul.mubr.msk.f32.vlgmr.msra.gmra.mrb[26].mxu0 %vm302_vm3, %v2264_v52 }
 0x848   :  { %3406 = vmatprep.mubr.msk.f32.mxu0 %vm2469_vm9, %v2936_v62 }
 0x914   :  { %v2344_v2 = vpop.f32.mrb[28].mxu1 }
 0x915   :  { %v2345_v3 = vadd.f32 %v2928_v1, %v2344_v2  ;;  %v3392_v4 = vpop.f32.mrb[29].mxu1 }
 0x917   :  { %3404 = vmatprep.subr.msk.mxu0 %vm2476_vm11, %v2345_v3 }
 0x918   :  { %3405 = vmatpush3.msk.msra.mxu0 %vm2476_vm11, %v2345_v3 }
 0x919   :  { %3407 = vmatmul.mubr.msk.f32.vlgmr.msra.gmra.mrb[26].mxu0 %vm2469_vm9, %v2937_v5  ;;  %3598 = vmatprep.subr.bf16.mxu0 %v3733_v12 }
 0x91a   :  { %3431 = vmatprep.mubr.msk.f32.mxu0 %vm3734_vm2, %v3735_v17  ;;  %3600 = vmatpush3.bf16.msra.mxu0 %v3599_v51 }
 0x91b   :  { %3601 = vmatprep.subr.bf16.mxu0 %v3733_v12 }
 0x9ec   :  { %v3408_v6 = vpop.f32.mrb[26].mxu0 }
 0x9ed   :  { %3695 = vtanh.f32 %v3408_v6  ;;  %v2546_v7 = vpop.f32.mrb[27].mxu0 }
 0x9ee   :  { %3697 = vtanh.f32 %v2546_v7 }
 0x9f7   :  { %v3696_v10 = vpop.eup %3695 }
 0x9f8   :  { %v3698_v11 = vpop.eup %3697  ;;  %v2562_v21 = vmul.f32 %v3696_v10, %v2941_v8 }
 0x9f9   :  { %v2561_v15 = vmul.f32 %v3698_v11, %v2941_v8 }
 0x9fa   :  { %v2566_v20 = vsel %vm302_vm3, %v2562_v21, 0.0 }
 0x9fb   :  { %v2563_v16 = vsel %vm302_vm3, %v2561_v15, 0.0 }
 0x9fc   :  { %2564 = vadd.xlane.f32.xlu0 %v2563_v16 }
 0xa00   :  { %2567 = vadd.xlane.f32.xlu0 %v2566_v20 }
 0xa89   :  { %v2565_v22 = vpop.xlane.xlu0 %2564 }
 0xa8d   :  { %v2568_v24 = vpop.xlane.xlu0 %2567 }
 0xa8e   :  { %v2569_v23 = vmax.f32 %v2565_v22, %v2568_v24 }
 0xa90   :  { %v2570_v25 = vrot.slane %v2569_v23, 4 }
 0xa92   :  { %v2571_v26 = vmax.f32 %v2569_v23, %v2570_v25 }
 0xa94   :  { %v2572_v27 = vrot.slane %v2571_v26, 2 }
 0xa96   :  { %v2573_v29 = vmax.f32 %v2571_v26, %v2572_v27 }
 0xa98   :  { %v2574_v30 = vrot.slane %v2573_v29, 1 }
 0xa9a   :  { %v2575_v31 = vmax.f32 %v2573_v29, %v2574_v30 }
 0xa9c   :  { %3606 = vpush %v2575_v31 }
 0xacd   :  { %s3607_s3 = spop %3606 }
 0xace   :  { %v2577_v33 = vstv %s3607_s3 }
 0xacf   :  { %v2578_v34 = vsub.f32 %v2565_v22, %v2577_v33  ;;  %v2579_v36 = vsub.f32 %v2568_v24, %v2577_v33 }
 0xad1   :  { %v2580_v37 = vmul.f32 1.442695, %v2578_v34  ;;  %v2582_v38 = vmul.f32 1.442695, %v2579_v36 }
 0xad3   :  { %3699 = vpow2.f32 %v2580_v37 }
 0xad4   :  { %3701 = vpow2.f32 %v2582_v38 }
 0xadd   :  { %v3700_v42 = vpop.eup %3699 }
 0xade   :  { %v3702_v39 = vpop.eup %3701  ;;  %v2599_v43 = vmul.f32 %v3700_v42, %v4075_v19 }
 0xadf   :  { %v2600_v40 = vmul.f32 %v3702_v39, %v2264_v52  ;;  %v3596_v46 = vpack.c.bf16 %v3702_v39, %v3700_v42 }
 0xae1   :  { %v3593_v44 = vpack.c.bf16 %v2600_v40, %v2599_v43 }
 0xae3   :  { %3594 = vmatpush3.bf16.msra.mxu1 %v3593_v44 }
 0xae4   :  { %3595 = vmatprep.subr.bf16.mxu1 %v3733_v12  ;;  %v2945_v12 = vld [vmem:[%s4172_s4 + $0x20] ss:$0 sm:$0xff] }
 0xae6   :  { %3414 = vmatmul.mubr.msk.f32.vlgmr.msra.gmra.mrb[30].mxu1 %vm2601_vm13, %v2942_v45 }
 0xae7   :  { %3597 = vmatpush3.bf16.msra.mxu1 %v3596_v46  ;;  %3420 = vmatprep.mubr.msk.f32.mxu1 %vm3734_vm2, %v3735_v17  ;;  %v2754_v17 = vld [vmem:[%s4172_s4 + $0x10] sm:$0xff]  ;;  %s3709_s4 = scalar_lea.vmem %s2857_s1, 32 }
 0xae8   :  { %v3602_v28 = vpack.c.bf16 %v2755_v53, %v2754_v17  ;;  %p3710_p0 = scmp.ne.s32.totalorder %s2857_s1, %s3709_s4  ;;  %p3715_p2 = scmp.lt.s32.totalorder %s3709_s4, %s3709_s4 }
 0xaea   :  { %3421 = vmatmul.mubr.msk.f32.vlgmr.msra.gmra.mrb[32].mxu1 %vm2601_vm13, %v2942_v45  ;;  %3603 = vmatpush3.bf16.msra.mxu0 %v3602_v28  ;;  %p3716_p3 = por %p3715_p2, %p3714_p1 }
 0xaec   :  { %p3717_p4 = pnand %p3716_p3, %p3710_p0 }
 0xbb9   :  { %v2671_v19 = vpop.f32.mrb[30].mxu1 }
 0xbba   :  { %v3415_v48 = vpop.f32.mrb[31].mxu1 }
 0xbbd   :  { %v2741_v49 = vpop.f32.mrb[32].mxu1 }
 0xbbe   :  { %2747 = vperm.xlu1 %3613, %v2741_v49   ;;  %v3422_v56 = vpop.f32.mrb[33].mxu1 }
 0xc3d   :  { %v2748_v18 = vpop.permute.xlu1 %2747 }
 0xc3e   :  { %3703 = vrcp.f32 %v2748_v18 }
 0xc48   :  { %v3704_v35 = vpop.eup %3703 }
 0xc49   :  { %v2751_v54 = vmul.f32 %v3704_v35, %v2671_v19 }
 0xc4b   :  { %3432 = vmatmul.mubr.msk.f32.vlgmr.msra.gmra.mrb[28].mxu0 %vm302_vm3, %v2751_v54 }
 0xd1e   :  { %v2830_v55 = vpop.f32.mrb[28].mxu0 }
 0xd1f   :  { %v2831_v57 = vadd.f32 %v2945_v12, %v2830_v55  ;;  %v3433_v9 = vpop.f32.mrb[29].mxu0 }
 0xd21   :  { %v2947_v58 = vmul.f32 -1.442695, %v2831_v57 }
 0xd23   :  { %3705 = vpow2.f32 %v2947_v58 }
 0xd2d   :  { %v3706_v59 = vpop.eup %3705 }
 0xd2e   :  { %v2837_v52 = vadd.f32 1.0, %v3706_v59 }
 0xd30   :  { %3707 = vrcp.f32 %v2837_v52 }
 0xd3a   :  { %v3708_v60 = vpop.eup %3707 }
 0xd3b   :  { %v2841_v61 = vmul.f32 2.0, %v3708_v60  ;;  %v2845_v63 = vmul.f32 10.0, %v3708_v60 }
 0xd3d   :  { %v2948_v32 = vadd.f32 -1.0, %v2841_v61 }
 0xd3f   :  { %v2844_v62 = vmul.f32 10.0, %v2948_v32 }
 0xd41   :  { %v2846_v0 = vsel %vm2843_vm14, %v2844_v62, %v2845_v63 }
 0xd42   :  { %v2847_v1 = vsel %vm2840_vm15, %v2948_v32, %v2846_v0 }
 0xd43   :  { %2849 = vst.msk [vmem:[#allocation3] sm:$0x3] %vm2848_vm0, %v2847_v1 }
 0xd44   :  { %3720 = shalt.err (!%p3717_p4)
}
 0xd45   :  { %s3721_s12 = scalar_lea.hbm %s4173_s5, 32 }
 0xd46   :  { %p3722_p5 = scmp.ne.s32.totalorder %s4173_s5, %s3721_s12  ;;  %p3725_p6 = scmp.lt.u32.totalorder %s3721_s12, %s4173_s5 }
 0xd48   :  { %p3727_p7 = pnand %p3725_p6, %p3722_p5 }
 0xd4a   :  { %3730 = shalt.err (!%p3727_p7)
}
 0xd4b   :  { %2859 = dma.vmem_to_hbm [thread:$0]  %s2857_s1, 32, %s4173_s5, [#allocation4]  }
 0xd4c   :  { %3731 = dma.done.wait [#allocation4], 32  }
 0xd4d   :  { %3732 = vsyncadd [#allocation4], 4294967264 }
 0xd4e   :  { %2863 = vsyncpa [#allocation4], 1 }

</bundles_post_ra>
